<compile_context>
chip_gen: v7x
topology: tpu7x:2x2x1
jax: 0.10.0
libtpu: 0.0.40
codegen_flags: <defaults>
</compile_context>

<pallas_src>
import functools
import math

import jax
import jax.numpy as jnp
from jax.experimental import pallas as pl
from jax.experimental.pallas import tpu as pltpu

LANE = 128          # vreg lane width (same on v5e/v6e/v7x) -> feature-axis padding unit
BN_EPS = 1e-5


def _round_up(v, m=LANE):
    return ((v + m - 1) // m) * m


def _pick_tile_m(m, cap=512):
    """Largest row tile <= cap that divides m (multiple of 8 when actually tiling)."""
    if m <= cap:
        return m
    for t in range(cap - cap % 8, 7, -8):
        if m % t == 0:
            return t
    return m  # fallback: single tile


def _vmem_limit_bytes(*shapes):
    """Double-buffered f32 buffers + 2x headroom, clamped to [16 MiB, 48 MiB]."""
    need = sum(2 * math.prod(s) * 4 for s in shapes)
    return int(min(48 * 1024 * 1024, max(2 * need, 16 * 1024 * 1024)))


# ---------------------------------------------------------------------------
# Phase 1: y = x @ W (bias dropped, see header) + per-tile partial batch stats.
# ---------------------------------------------------------------------------
def _linear_stats_kernel(x_ref, w_ref, y_ref, st_ref):
    # Native-dtype operands straight to the MXU; f32 accumulation.
    y = jnp.dot(x_ref[...], w_ref[...], preferred_element_type=jnp.float32)
    y_ref[...] = y.astype(y_ref.dtype)
    st_ref[0:1, :] = jnp.sum(y, axis=0, keepdims=True)        # partial sum
    st_ref[1:2, :] = jnp.sum(y * y, axis=0, keepdims=True)    # partial sum of squares


# Phase 2a: o = SiLU(y * scale + shift), written in place over y (aliased).
def _bn_silu_kernel(scale_ref, shift_ref, y_ref, o_ref):
    z = y_ref[...] * scale_ref[...] + shift_ref[...]
    o_ref[...] = (z * jax.nn.sigmoid(z)).astype(o_ref.dtype)


# Phase 2b (last BasicLayer): fuse the final fc Linear into the normalize pass.
def _bn_silu_fc_kernel(scale_ref, shift_ref, wfc_ref, bfc_ref, y_ref, o_ref):
    z = y_ref[...] * scale_ref[...] + shift_ref[...]
    a = z * jax.nn.sigmoid(z)
    o_ref[...] = (jnp.dot(a, wfc_ref[...], preferred_element_type=jnp.float32)
                  + bfc_ref[...]).astype(o_ref.dtype)


def _basic_layer(x_p, w, gamma, beta, *, tile_m, fc_w=None, fc_b=None):
    """One BasicLayer on the flattened (M, IN_P) slab.

    x_p : (M, IN_P) activations; columns beyond the real feature count are zero.
    w   : (real_in, real_out) Linear weight (already transposed to x @ w layout).
    Returns (M, OUT_P) lane-padded activations, or — if fc_w/fc_b are given —
    (M, LANE) with the fused final fc output in lane 0.
    """
    M, IN_P = x_p.shape
    real_in, real_out = w.shape
    OUT_P = _round_up(real_out)
    T = M // tile_m
    assert T * tile_m == M, "row count must be divisible by the row tile"

    # Zero-padded params: padded output columns stay exactly 0 through matmul/BN/SiLU.
    w_p = jnp.pad(w.astype(jnp.float32), ((0, IN_P - real_in), (0, OUT_P - real_out)))
    gamma_p = jnp.pad(gamma.astype(jnp.float32), (0, OUT_P - real_out))
    beta_p = jnp.pad(beta.astype(jnp.float32), (0, OUT_P - real_out))

    # ---- phase 1: tiled matmul + per-tile partial stats --------------------
    y_p, stats = pl.pallas_call(
        _linear_stats_kernel,
        grid=(T,),
        in_specs=[
            pl.BlockSpec((tile_m, IN_P), lambda i: (i, 0)),        # x tile (pipelined)
            pl.BlockSpec((IN_P, OUT_P), lambda i: (0, 0)),         # W resident across grid
        ],
        out_specs=[
            pl.BlockSpec((tile_m, OUT_P), lambda i: (i, 0)),       # y tile (lane-dense)
            pl.BlockSpec((None, 2, OUT_P), lambda i: (i, 0, 0)),   # per-tile [sum; sumsq]
        ],
        out_shape=[
            jax.ShapeDtypeStruct((M, OUT_P), jnp.float32),
            jax.ShapeDtypeStruct((T, 2, OUT_P), jnp.float32),
        ],
        compiler_params=pltpu.CompilerParams(
            dimension_semantics=("parallel",),
            vmem_limit_bytes=_vmem_limit_bytes(
                (tile_m, IN_P), (IN_P, OUT_P), (tile_m, OUT_P), (2, OUT_P)),
        ),
        cost_estimate=pl.CostEstimate(
            flops=2 * M * IN_P * OUT_P,
            transcendentals=0,
            bytes_accessed=4 * (M * IN_P + IN_P * OUT_P + M * OUT_P + T * 2 * OUT_P),
        ),
    )(x_p, w_p)

    # ---- batch statistics (tiny (T, 2, OUT_P) reduction; plain JAX) --------
    mean = jnp.sum(stats[:, 0, :], axis=0) / M
    ex2 = jnp.sum(stats[:, 1, :], axis=0) / M
    var = jnp.maximum(ex2 - mean * mean, 0.0)          # guard f32 cancellation
    rstd = jax.lax.rsqrt(var + BN_EPS)
    scale = (gamma_p * rstd).reshape(1, OUT_P)
    shift = (beta_p - gamma_p * rstd * mean).reshape(1, OUT_P)

    if fc_w is None:
        # ---- phase 2a: normalize + SiLU, in place over y --------------------
        return pl.pallas_call(
            _bn_silu_kernel,
            grid=(T,),
            in_specs=[
                pl.BlockSpec((1, OUT_P), lambda i: (0, 0)),
                pl.BlockSpec((1, OUT_P), lambda i: (0, 0)),
                pl.BlockSpec((tile_m, OUT_P), lambda i: (i, 0)),
            ],
            out_specs=pl.BlockSpec((tile_m, OUT_P), lambda i: (i, 0)),
            out_shape=jax.ShapeDtypeStruct((M, OUT_P), jnp.float32),
            input_output_aliases={2: 0},        # reuse the y buffer for the output
            compiler_params=pltpu.CompilerParams(
                dimension_semantics=("parallel",),
                vmem_limit_bytes=_vmem_limit_bytes((tile_m, OUT_P), (tile_m, OUT_P)),
            ),
            cost_estimate=pl.CostEstimate(
                flops=4 * M * OUT_P,
                transcendentals=M * OUT_P,
                bytes_accessed=8 * M * OUT_P,
            ),
        )(scale, shift, y_p)

    # ---- phase 2b: normalize + SiLU + fused final fc ------------------------
    FC_P = LANE
    wfc_p = jnp.pad(fc_w.astype(jnp.float32),
                    ((0, OUT_P - fc_w.shape[0]), (0, FC_P - fc_w.shape[1])))
    bfc_p = jnp.pad(fc_b.astype(jnp.float32), (0, FC_P - fc_b.shape[0])).reshape(1, FC_P)
    return pl.pallas_call(
        _bn_silu_fc_kernel,
        grid=(T,),
        in_specs=[
            pl.BlockSpec((1, OUT_P), lambda i: (0, 0)),
            pl.BlockSpec((1, OUT_P), lambda i: (0, 0)),
            pl.BlockSpec((OUT_P, FC_P), lambda i: (0, 0)),
            pl.BlockSpec((1, FC_P), lambda i: (0, 0)),
            pl.BlockSpec((tile_m, OUT_P), lambda i: (i, 0)),
        ],
        out_specs=pl.BlockSpec((tile_m, FC_P), lambda i: (i, 0)),
        out_shape=jax.ShapeDtypeStruct((M, FC_P), jnp.float32),
        compiler_params=pltpu.CompilerParams(
            dimension_semantics=("parallel",),
            vmem_limit_bytes=_vmem_limit_bytes(
                (tile_m, OUT_P), (OUT_P, FC_P), (tile_m, FC_P)),
        ),
        cost_estimate=pl.CostEstimate(
            flops=4 * M * OUT_P + 2 * M * OUT_P * FC_P,
            transcendentals=M * OUT_P,
            bytes_accessed=4 * (2 * M * OUT_P + OUT_P * FC_P + M * FC_P),
        ),
    )(scale, shift, wfc_p, bfc_p, y_p)


# ---------------------------------------------------------------------------
# Net forward
# ---------------------------------------------------------------------------
def _safe_embedding(x_id, emb_table):
    """SafeEmbedding: ids >= num_embeddings map to a zero vector."""
    n_embed = emb_table.shape[0]
    seen = x_id < n_embed
    safe_ids = jnp.where(seen, x_id, 0)
    emb = jnp.take(emb_table, safe_ids, axis=0)
    return jnp.where(seen[..., None], emb, 0.0)


def net_forward(params, x_id, x_feat, *, tile_m_cap=512):
    # TODO(synk): SafeEmbedding gather + concat are data-dependent layout plumbing done in
    #             plain JAX; all dense compute (Linear/BN/SiLU/fc) runs in Pallas kernels.
    emb = _safe_embedding(x_id, params["emb"])
    h = jnp.concatenate([emb, x_feat.astype(emb.dtype)], axis=-1)
    N, L, in_size = h.shape
    M = N * L
    tile_m = _pick_tile_m(M, tile_m_cap)
    h = h.reshape(M, in_size)                 # FlattenBatchNorm1d: (N, L, C) -> (N*L, C)
    n_layers = len(params["layers"])
    for idx, lyr in enumerate(params["layers"]):
        if idx == n_layers - 1:
            h = _basic_layer(h, lyr["w"], lyr["gamma"], lyr["beta"], tile_m=tile_m,
                             fc_w=params["fc_w"], fc_b=params["fc_b"])
        else:
            h = _basic_layer(h, lyr["w"], lyr["gamma"], lyr["beta"], tile_m=tile_m)
    return h[:, 0].reshape(N, L)              # fc output lives in lane 0 of the padded slab


# ---------------------------------------------------------------------------
# Pure-JAX reference (includes the Linear biases — validates the bias-drop algebra).
# ---------------------------------------------------------------------------
def reference_forward(params, x_id, x_feat):
    emb = _safe_embedding(x_id, params["emb"])
    h = jnp.concatenate([emb, x_feat], axis=-1)
    N, L, _ = h.shape
    h = h.reshape(N * L, -1)
    hp = jax.lax.Precision.HIGHEST
    for lyr in params["layers"]:
        y = jnp.dot(h, lyr["w"], precision=hp) + lyr["b"]
        mean = jnp.mean(y, axis=0)
        var = jnp.mean(jnp.square(y - mean), axis=0)      # biased, train-mode BN
        yhat = (y - mean) * jax.lax.rsqrt(var + BN_EPS) * lyr["gamma"] + lyr["beta"]
        h = yhat * jax.nn.sigmoid(yhat)
    out = jnp.dot(h, params["fc_w"], precision=hp) + params["fc_b"]
    return out[:, 0].reshape(N, L)


if __name__ == "__main__":
    # Small shapes consistent with the module: batch=2, seq=128, emb_dim=24, n_feature=8,
    # args.szs=[64, 48], args.mhas=() (no MHA), args.dropout=0.0.
    N, L = 2, 128
    n_embed, emb_dim, n_feature = 50, 24, 8
    szs = [64, 48]
    in_size = emb_dim + n_feature

    key = jax.random.PRNGKey(0)
    keys = jax.random.split(key, 16)
    k = iter(keys)

    emb_table = 0.02 * jax.random.normal(next(k), (n_embed, emb_dim), jnp.float32)

    layers = []
    prev = in_size
    for out_sz in szs:
        # kaiming_normal_(fan_out, relu) for the Linear weight, stored transposed (in, out).
        w = math.sqrt(2.0 / out_sz) * jax.random.normal(next(k), (prev, out_sz), jnp.float32)
        b = jax.random.uniform(next(k), (out_sz,), jnp.float32,
                               -1.0 / math.sqrt(prev), 1.0 / math.sqrt(prev))
        gamma = 1.0 + 0.1 * jax.random.normal(next(k), (out_sz,), jnp.float32)
        beta = 0.1 * jax.random.normal(next(k), (out_sz,), jnp.float32)
        layers.append(dict(w=w, b=b, gamma=gamma, beta=beta))
        prev = out_sz

    fc_w = math.sqrt(2.0) * jax.random.normal(next(k), (prev, 1), jnp.float32)
    fc_b = jax.random.uniform(next(k), (1,), jnp.float32,
                              -1.0 / math.sqrt(prev), 1.0 / math.sqrt(prev))
    params = dict(emb=emb_table, layers=layers, fc_w=fc_w, fc_b=fc_b)

    x_id = jax.random.randint(next(k), (N, L), 0, n_embed + 10)   # includes unseen ids
    x_feat = jax.random.normal(next(k), (N, L, n_feature), jnp.float32)

    # tile cap 128 (default 512) so this toy M=256 genuinely exercises the multi-tile
    # pipeline + partial-stat reduction path; production default targets v7x's 64 MiB VMEM.
    net_fn = jax.jit(functools.partial(net_forward, tile_m_cap=128))
    out = net_fn(params, x_id, x_feat)
    jax.block_until_ready(out)

    ref = reference_forward(params, x_id, x_feat)
    assert out.shape == (N, L) and out.dtype == jnp.float32
    max_err = float(jnp.max(jnp.abs(out - ref)))
    # Tolerance covers TPU matmul precision-path differences between XLA and the MXU kernel.
    assert jnp.allclose(out, ref, rtol=2e-2, atol=2e-2), f"mismatch, max |err| = {max_err}"
    print("KERNEL_OK")
</pallas_src>

<mosaic_0001>
module attributes {stable_mosaic.version = 11 : i64} {
  func.func @_linear_stats_kernel(%arg0: i32, %arg1: memref<128x32xf32, #tpu.memory_space<vmem>>, %arg2: memref<32x128xf32, #tpu.memory_space<vmem>>, %arg3: memref<128x128xf32, #tpu.memory_space<vmem>>, %arg4: memref<1x2x128xf32, #tpu.memory_space<vmem>>) attributes {dimension_semantics = [#tpu.dimension_semantics<parallel>], iteration_bounds = array<i64: 2>, scalar_prefetch = 0 : i64, scratch_operands = 0 : i64, tpu.core_type = #tpu.core_type<tc>, window_params = [{transform_indices = @transform_0, window_bounds = array<i64: 128, 32>}, {pipeline_mode = #tpu.pipeline_mode<synchronous>, transform_indices = @transform_1, window_bounds = array<i64: 32, 128>}, {transform_indices = @transform_2, window_bounds = array<i64: 128, 128>}, {transform_indices = @transform_3, window_bounds = array<i64: 1, 2, 128>}]} {
    %c0 = arith.constant 0 : index
    %c0_0 = arith.constant 0 : index
    %0 = vector.load %arg1[%c0, %c0_0] : memref<128x32xf32, #tpu.memory_space<vmem>>, vector<128x32xf32>
    %c0_1 = arith.constant 0 : index
    %c0_2 = arith.constant 0 : index
    %1 = vector.load %arg2[%c0_1, %c0_2] : memref<32x128xf32, #tpu.memory_space<vmem>>, vector<32x128xf32>
    %cst = arith.constant dense<0.000000e+00> : vector<128x128xf32>
    %2 = tpu.matmul %0, %1, %cst {dimension_numbers = #tpu.dot_dimension_numbers<[1], [0], [0], [1], [0, 0, 1, 1], [], []>} : vector<128x32xf32>, vector<32x128xf32>, vector<128x128xf32> -> vector<128x128xf32>
    %c0_3 = arith.constant 0 : index
    %c0_4 = arith.constant 0 : index
    %3 = vector.load %arg3[%c0_3, %c0_4] : memref<128x128xf32, #tpu.memory_space<vmem>>, vector<128x128xf32>
    tpu.vector_store %arg3[%c0_3, %c0_4], %2 {strides = array<i32>} : memref<128x128xf32, #tpu.memory_space<vmem>>, vector<128x128xf32>,
    %cst_5 = arith.constant dense<0.000000e+00> : vector<128xf32>
    %4 = vector.multi_reduction <add>, %2, %cst_5 [0] : vector<128x128xf32> to vector<128xf32>
    %5 = vector.shape_cast %4 : vector<128xf32> to vector<1x128xf32>
    %c0_6 = arith.constant 0 : index
    %c0_7 = arith.constant 0 : index
    %c0_8 = arith.constant 0 : index
    %6 = vector.load %arg4[%c0_6, %c0_7, %c0_8] : memref<1x2x128xf32, #tpu.memory_space<vmem>>, vector<1x1x128xf32>
    %7 = vector.shape_cast %6 : vector<1x1x128xf32> to vector<1x128xf32>
    %8 = vector.shape_cast %5 : vector<1x128xf32> to vector<1x1x128xf32>
    tpu.vector_store %arg4[%c0_6, %c0_7, %c0_8], %8 {strides = array<i32>} : memref<1x2x128xf32, #tpu.memory_space<vmem>>, vector<1x1x128xf32>,
    %9 = arith.mulf %2, %2 : vector<128x128xf32>
    %cst_9 = arith.constant dense<0.000000e+00> : vector<128xf32>
    %10 = vector.multi_reduction <add>, %9, %cst_9 [0] : vector<128x128xf32> to vector<128xf32>
    %11 = vector.shape_cast %10 : vector<128xf32> to vector<1x128xf32>
    %c0_10 = arith.constant 0 : index
    %c1 = arith.constant 1 : index
    %c0_11 = arith.constant 0 : index
    %12 = vector.load %arg4[%c0_10, %c1, %c0_11] : memref<1x2x128xf32, #tpu.memory_space<vmem>>, vector<1x1x128xf32>
    %13 = vector.shape_cast %12 : vector<1x1x128xf32> to vector<1x128xf32>
    %14 = vector.shape_cast %11 : vector<1x128xf32> to vector<1x1x128xf32>
    tpu.vector_store %arg4[%c0_10, %c1, %c0_11], %14 {strides = array<i32>} : memref<1x2x128xf32, #tpu.memory_space<vmem>>, vector<1x1x128xf32>,
    return
  }
  func.func @transform_0(%arg0: i32) -> (i32, i32) {
    %c0_i32 = arith.constant 0 : i32
    %c0_i32_0 = arith.constant 0 : i32
    return %arg0, %c0_i32 : i32, i32
  }
  func.func @transform_1(%arg0: i32) -> (i32, i32) {
    %c0_i32 = arith.constant 0 : i32
    %c0_i32_0 = arith.constant 0 : i32
    %c0_i32_1 = arith.constant 0 : i32
    return %c0_i32, %c0_i32_0 : i32, i32
  }
  func.func @transform_2(%arg0: i32) -> (i32, i32) {
    %c0_i32 = arith.constant 0 : i32
    %c0_i32_0 = arith.constant 0 : i32
    return %arg0, %c0_i32 : i32, i32
  }
  func.func @transform_3(%arg0: i32) -> (i32, i32, i32) {
    %c0_i32 = arith.constant 0 : i32
    %c0_i32_0 = arith.constant 0 : i32
    %c0_i32_1 = arith.constant 0 : i32
    return %arg0, %c0_i32, %c0_i32_0 : i32, i32, i32
  }
}

module attributes {stable_mosaic.version = 11 : i64} {
  func.func @_bn_silu_kernel(%arg0: i32, %arg1: memref<1x128xf32, #tpu.memory_space<vmem>>, %arg2: memref<1x128xf32, #tpu.memory_space<vmem>>, %arg3: memref<128x128xf32, #tpu.memory_space<vmem>>, %arg4: memref<128x128xf32, #tpu.memory_space<vmem>>) attributes {dimension_semantics = [#tpu.dimension_semantics<parallel>], iteration_bounds = array<i64: 2>, scalar_prefetch = 0 : i64, scratch_operands = 0 : i64, tpu.core_type = #tpu.core_type<tc>, window_params = [{pipeline_mode = #tpu.pipeline_mode<synchronous>, transform_indices = @transform_0, window_bounds = array<i64: 1, 128>}, {pipeline_mode = #tpu.pipeline_mode<synchronous>, transform_indices = @transform_1, window_bounds = array<i64: 1, 128>}, {transform_indices = @transform_2, window_bounds = array<i64: 128, 128>}, {transform_indices = @transform_3, window_bounds = array<i64: 128, 128>}]} {
    %c0 = arith.constant 0 : index
    %c0_0 = arith.constant 0 : index
    %0 = vector.load %arg3[%c0, %c0_0] : memref<128x128xf32, #tpu.memory_space<vmem>>, vector<128x128xf32>
    %c0_1 = arith.constant 0 : index
    %c0_2 = arith.constant 0 : index
    %1 = vector.load %arg1[%c0_1, %c0_2] : memref<1x128xf32, #tpu.memory_space<vmem>>, vector<1x128xf32>
    %2 = vector.broadcast %1 : vector<1x128xf32> to vector<128x128xf32>
    %3 = arith.mulf %0, %2 : vector<128x128xf32>
    %c0_3 = arith.constant 0 : index
    %c0_4 = arith.constant 0 : index
    %4 = vector.load %arg2[%c0_3, %c0_4] : memref<1x128xf32, #tpu.memory_space<vmem>>, vector<1x128xf32>
    %5 = vector.broadcast %4 : vector<1x128xf32> to vector<128x128xf32>
    %6 = arith.addf %3, %5 : vector<128x128xf32>
    %7 = arith.negf %6 : vector<128x128xf32>
    %8 = math.exp %7 : vector<128x128xf32>
    %cst = arith.constant 1.000000e+00 : f32
    %9 = vector.broadcast %cst : f32 to vector<128x128xf32>
    %10 = arith.addf %9, %8 : vector<128x128xf32>
    %11 = arith.divf %9, %10 : vector<128x128xf32>
    %12 = arith.mulf %6, %11 : vector<128x128xf32>
    %c0_5 = arith.constant 0 : index
    %c0_6 = arith.constant 0 : index
    %13 = vector.load %arg4[%c0_5, %c0_6] : memref<128x128xf32, #tpu.memory_space<vmem>>, vector<128x128xf32>
    tpu.vector_store %arg4[%c0_5, %c0_6], %12 {strides = array<i32>} : memref<128x128xf32, #tpu.memory_space<vmem>>, vector<128x128xf32>,
    return
  }
  func.func @transform_0(%arg0: i32) -> (i32, i32) {
    %c0_i32 = arith.constant 0 : i32
    %c0_i32_0 = arith.constant 0 : i32
    %c0_i32_1 = arith.constant 0 : i32
    return %c0_i32, %c0_i32_0 : i32, i32
  }
  func.func @transform_1(%arg0: i32) -> (i32, i32) {
    %c0_i32 = arith.constant 0 : i32
    %c0_i32_0 = arith.constant 0 : i32
    %c0_i32_1 = arith.constant 0 : i32
    return %c0_i32, %c0_i32_0 : i32, i32
  }
  func.func @transform_2(%arg0: i32) -> (i32, i32) {
    %c0_i32 = arith.constant 0 : i32
    %c0_i32_0 = arith.constant 0 : i32
    return %arg0, %c0_i32 : i32, i32
  }
  func.func @transform_3(%arg0: i32) -> (i32, i32) {
    %c0_i32 = arith.constant 0 : i32
    %c0_i32_0 = arith.constant 0 : i32
    return %arg0, %c0_i32 : i32, i32
  }
}

module attributes {stable_mosaic.version = 11 : i64} {
  func.func @_linear_stats_kernel(%arg0: i32, %arg1: memref<128x128xf32, #tpu.memory_space<vmem>>, %arg2: memref<128x128xf32, #tpu.memory_space<vmem>>, %arg3: memref<128x128xf32, #tpu.memory_space<vmem>>, %arg4: memref<1x2x128xf32, #tpu.memory_space<vmem>>) attributes {dimension_semantics = [#tpu.dimension_semantics<parallel>], iteration_bounds = array<i64: 2>, scalar_prefetch = 0 : i64, scratch_operands = 0 : i64, tpu.core_type = #tpu.core_type<tc>, window_params = [{transform_indices = @transform_0, window_bounds = array<i64: 128, 128>}, {pipeline_mode = #tpu.pipeline_mode<synchronous>, transform_indices = @transform_1, window_bounds = array<i64: 128, 128>}, {transform_indices = @transform_2, window_bounds = array<i64: 128, 128>}, {transform_indices = @transform_3, window_bounds = array<i64: 1, 2, 128>}]} {
    %c0 = arith.constant 0 : index
    %c0_0 = arith.constant 0 : index
    %0 = vector.load %arg1[%c0, %c0_0] : memref<128x128xf32, #tpu.memory_space<vmem>>, vector<128x128xf32>
    %c0_1 = arith.constant 0 : index
    %c0_2 = arith.constant 0 : index
    %1 = vector.load %arg2[%c0_1, %c0_2] : memref<128x128xf32, #tpu.memory_space<vmem>>, vector<128x128xf32>
    %cst = arith.constant dense<0.000000e+00> : vector<128x128xf32>
    %2 = tpu.matmul %0, %1, %cst {dimension_numbers = #tpu.dot_dimension_numbers<[1], [0], [0], [1], [0, 0, 1, 1], [], []>} : vector<128x128xf32>, vector<128x128xf32>, vector<128x128xf32> -> vector<128x128xf32>
    %c0_3 = arith.constant 0 : index
    %c0_4 = arith.constant 0 : index
    %3 = vector.load %arg3[%c0_3, %c0_4] : memref<128x128xf32, #tpu.memory_space<vmem>>, vector<128x128xf32>
    tpu.vector_store %arg3[%c0_3, %c0_4], %2 {strides = array<i32>} : memref<128x128xf32, #tpu.memory_space<vmem>>, vector<128x128xf32>,
    %cst_5 = arith.constant dense<0.000000e+00> : vector<128xf32>
    %4 = vector.multi_reduction <add>, %2, %cst_5 [0] : vector<128x128xf32> to vector<128xf32>
    %5 = vector.shape_cast %4 : vector<128xf32> to vector<1x128xf32>
    %c0_6 = arith.constant 0 : index
    %c0_7 = arith.constant 0 : index
    %c0_8 = arith.constant 0 : index
    %6 = vector.load %arg4[%c0_6, %c0_7, %c0_8] : memref<1x2x128xf32, #tpu.memory_space<vmem>>, vector<1x1x128xf32>
    %7 = vector.shape_cast %6 : vector<1x1x128xf32> to vector<1x128xf32>
    %8 = vector.shape_cast %5 : vector<1x128xf32> to vector<1x1x128xf32>
    tpu.vector_store %arg4[%c0_6, %c0_7, %c0_8], %8 {strides = array<i32>} : memref<1x2x128xf32, #tpu.memory_space<vmem>>, vector<1x1x128xf32>,
    %9 = arith.mulf %2, %2 : vector<128x128xf32>
    %cst_9 = arith.constant dense<0.000000e+00> : vector<128xf32>
    %10 = vector.multi_reduction <add>, %9, %cst_9 [0] : vector<128x128xf32> to vector<128xf32>
    %11 = vector.shape_cast %10 : vector<128xf32> to vector<1x128xf32>
    %c0_10 = arith.constant 0 : index
    %c1 = arith.constant 1 : index
    %c0_11 = arith.constant 0 : index
    %12 = vector.load %arg4[%c0_10, %c1, %c0_11] : memref<1x2x128xf32, #tpu.memory_space<vmem>>, vector<1x1x128xf32>
    %13 = vector.shape_cast %12 : vector<1x1x128xf32> to vector<1x128xf32>
    %14 = vector.shape_cast %11 : vector<1x128xf32> to vector<1x1x128xf32>
    tpu.vector_store %arg4[%c0_10, %c1, %c0_11], %14 {strides = array<i32>} : memref<1x2x128xf32, #tpu.memory_space<vmem>>, vector<1x1x128xf32>,
    return
  }
  func.func @transform_0(%arg0: i32) -> (i32, i32) {
    %c0_i32 = arith.constant 0 : i32
    %c0_i32_0 = arith.constant 0 : i32
    return %arg0, %c0_i32 : i32, i32
  }
  func.func @transform_1(%arg0: i32) -> (i32, i32) {
    %c0_i32 = arith.constant 0 : i32
    %c0_i32_0 = arith.constant 0 : i32
    %c0_i32_1 = arith.constant 0 : i32
    return %c0_i32, %c0_i32_0 : i32, i32
  }
  func.func @transform_2(%arg0: i32) -> (i32, i32) {
    %c0_i32 = arith.constant 0 : i32
    %c0_i32_0 = arith.constant 0 : i32
    return %arg0, %c0_i32 : i32, i32
  }
  func.func @transform_3(%arg0: i32) -> (i32, i32, i32) {
    %c0_i32 = arith.constant 0 : i32
    %c0_i32_0 = arith.constant 0 : i32
    %c0_i32_1 = arith.constant 0 : i32
    return %arg0, %c0_i32, %c0_i32_0 : i32, i32, i32
  }
}

module attributes {stable_mosaic.version = 11 : i64} {
  func.func @_bn_silu_fc_kernel(%arg0: i32, %arg1: memref<1x128xf32, #tpu.memory_space<vmem>>, %arg2: memref<1x128xf32, #tpu.memory_space<vmem>>, %arg3: memref<128x128xf32, #tpu.memory_space<vmem>>, %arg4: memref<1x128xf32, #tpu.memory_space<vmem>>, %arg5: memref<128x128xf32, #tpu.memory_space<vmem>>, %arg6: memref<128x128xf32, #tpu.memory_space<vmem>>) attributes {dimension_semantics = [#tpu.dimension_semantics<parallel>], iteration_bounds = array<i64: 2>, scalar_prefetch = 0 : i64, scratch_operands = 0 : i64, tpu.core_type = #tpu.core_type<tc>, window_params = [{pipeline_mode = #tpu.pipeline_mode<synchronous>, transform_indices = @transform_0, window_bounds = array<i64: 1, 128>}, {pipeline_mode = #tpu.pipeline_mode<synchronous>, transform_indices = @transform_1, window_bounds = array<i64: 1, 128>}, {pipeline_mode = #tpu.pipeline_mode<synchronous>, transform_indices = @transform_2, window_bounds = array<i64: 128, 128>}, {pipeline_mode = #tpu.pipeline_mode<synchronous>, transform_indices = @transform_3, window_bounds = array<i64: 1, 128>}, {transform_indices = @transform_4, window_bounds = array<i64: 128, 128>}, {transform_indices = @transform_5, window_bounds = array<i64: 128, 128>}]} {
    %c0 = arith.constant 0 : index
    %c0_0 = arith.constant 0 : index
    %0 = vector.load %arg5[%c0, %c0_0] : memref<128x128xf32, #tpu.memory_space<vmem>>, vector<128x128xf32>
    %c0_1 = arith.constant 0 : index
    %c0_2 = arith.constant 0 : index
    %1 = vector.load %arg1[%c0_1, %c0_2] : memref<1x128xf32, #tpu.memory_space<vmem>>, vector<1x128xf32>
    %2 = vector.broadcast %1 : vector<1x128xf32> to vector<128x128xf32>
    %3 = arith.mulf %0, %2 : vector<128x128xf32>
    %c0_3 = arith.constant 0 : index
    %c0_4 = arith.constant 0 : index
    %4 = vector.load %arg2[%c0_3, %c0_4] : memref<1x128xf32, #tpu.memory_space<vmem>>, vector<1x128xf32>
    %5 = vector.broadcast %4 : vector<1x128xf32> to vector<128x128xf32>
    %6 = arith.addf %3, %5 : vector<128x128xf32>
    %7 = arith.negf %6 : vector<128x128xf32>
    %8 = math.exp %7 : vector<128x128xf32>
    %cst = arith.constant 1.000000e+00 : f32
    %9 = vector.broadcast %cst : f32 to vector<128x128xf32>
    %10 = arith.addf %9, %8 : vector<128x128xf32>
    %11 = arith.divf %9, %10 : vector<128x128xf32>
    %12 = arith.mulf %6, %11 : vector<128x128xf32>
    %c0_5 = arith.constant 0 : index
    %c0_6 = arith.constant 0 : index
    %13 = vector.load %arg3[%c0_5, %c0_6] : memref<128x128xf32, #tpu.memory_space<vmem>>, vector<128x128xf32>
    %cst_7 = arith.constant dense<0.000000e+00> : vector<128x128xf32>
    %14 = tpu.matmul %12, %13, %cst_7 {dimension_numbers = #tpu.dot_dimension_numbers<[1], [0], [0], [1], [0, 0, 1, 1], [], []>} : vector<128x128xf32>, vector<128x128xf32>, vector<128x128xf32> -> vector<128x128xf32>
    %c0_8 = arith.constant 0 : index
    %c0_9 = arith.constant 0 : index
    %15 = vector.load %arg4[%c0_8, %c0_9] : memref<1x128xf32, #tpu.memory_space<vmem>>, vector<1x128xf32>
    %16 = vector.broadcast %15 : vector<1x128xf32> to vector<128x128xf32>
    %17 = arith.addf %14, %16 : vector<128x128xf32>
    %c0_10 = arith.constant 0 : index
    %c0_11 = arith.constant 0 : index
    %18 = vector.load %arg6[%c0_10, %c0_11] : memref<128x128xf32, #tpu.memory_space<vmem>>, vector<128x128xf32>
    tpu.vector_store %arg6[%c0_10, %c0_11], %17 {strides = array<i32>} : memref<128x128xf32, #tpu.memory_space<vmem>>, vector<128x128xf32>,
    return
  }
  func.func @transform_0(%arg0: i32) -> (i32, i32) {
    %c0_i32 = arith.constant 0 : i32
    %c0_i32_0 = arith.constant 0 : i32
    %c0_i32_1 = arith.constant 0 : i32
    return %c0_i32, %c0_i32_0 : i32, i32
  }
  func.func @transform_1(%arg0: i32) -> (i32, i32) {
    %c0_i32 = arith.constant 0 : i32
    %c0_i32_0 = arith.constant 0 : i32
    %c0_i32_1 = arith.constant 0 : i32
    return %c0_i32, %c0_i32_0 : i32, i32
  }
  func.func @transform_2(%arg0: i32) -> (i32, i32) {
    %c0_i32 = arith.constant 0 : i32
    %c0_i32_0 = arith.constant 0 : i32
    %c0_i32_1 = arith.constant 0 : i32
    return %c0_i32, %c0_i32_0 : i32, i32
  }
  func.func @transform_3(%arg0: i32) -> (i32, i32) {
    %c0_i32 = arith.constant 0 : i32
    %c0_i32_0 = arith.constant 0 : i32
    %c0_i32_1 = arith.constant 0 : i32
    return %c0_i32, %c0_i32_0 : i32, i32
  }
  func.func @transform_4(%arg0: i32) -> (i32, i32) {
    %c0_i32 = arith.constant 0 : i32
    %c0_i32_0 = arith.constant 0 : i32
    return %arg0, %c0_i32 : i32, i32
  }
  func.func @transform_5(%arg0: i32) -> (i32, i32) {
    %c0_i32 = arith.constant 0 : i32
    %c0_i32_0 = arith.constant 0 : i32
    return %arg0, %c0_i32 : i32, i32
  }
}

</mosaic_0001>

<bundles_post_ra>
// kernel: net_forward.5
= control target key start
LH: loop header
LB: loop body
LE: loop exit
PB: predicated region body
PF: predicated region fallthrough
CT: control target
= control target key end

     0   :  { %s549_s12 = smov 0   ;;  %s679_s0 = inlined_call_operand.vmem [shape: f32[1,128], index: 0, kind: input, shape index: {}]   ;;  %s680_s1 = inlined_call_operand.vmem [shape: f32[1,128], index: 1, kind: input, shape index: {}]   ;;  %s681_s2 = inlined_call_operand.vmem [shape: f32[256,128], index: 2, kind: input, shape index: {}, may-alias: {2,3}]   ;;  %s682_s3 = inlined_call_operand.vmem [shape: f32[256,128], index: 3, kind: output, shape index: {}, may-alias: {2,3}]  }
   0x1 LB: > { %s420_s13 = sadd.s32 4294967295, %s527_s12   ;;  %p424_p0 = scmp.ge.s32.totalorder %s527_s12, 1  ;;  %s527_s12 = sphi %s549_s12, %s13_s12  }
   0x2   : > { %p138_p1 = scmp.lt.s32.totalorder %s527_s12, 3 }
   0x4   : > { %p139_p2 = pnand %p424_p0, %p138_p1 }
   0x5   : > { %s425_s14 = sshll.u32 (!%p139_p2), %s420_s13, 4  ;;  %v429_v0 = vld [vmem:[%s679_s0] ss:$0 sm:$0xff] (!%p139_p2) }
   0x6   : > { %142 = sbr.rel (%p139_p2) target bundleno = 69 (0x45), region = 32  ;;  %p163_p3 = scmp.lt.s32.totalorder (!%p139_p2), %s425_s14, 31  ;;  %v430_v12 = vld [vmem:[%s680_s1] ss:$0 sm:$0xff] (!%p139_p2) }
   0xd   : > { %s684_s14 = smov (!%p163_p3, %s425_s14), 31 }
   0xe   : > { %s426_s15 = sshll.u32 %s684_s14, 3 }
   0xf   : > { %s568_s20 = scalar_lea.vmem %s681_s2, %s426_s15  ;;  %s642_s25 = scalar_lea.vmem %s682_s3, %s426_s15 }
  0x10   : > { %v174_v1 = vld [vmem:[%s568_s20] sm:$0xff]  ;;  %v175_v2 = vld [vmem:[%s568_s20 + $0x8] sm:$0xff]  ;;  %v176_v3 = vld [vmem:[%s568_s20 + $0x10] sm:$0xff] }
  0x11   : > { %v177_v4 = vld [vmem:[%s568_s20 + $0x18] sm:$0xff]  ;;  %v178_v5 = vld [vmem:[%s568_s20 + $0x20] sm:$0xff]  ;;  %v179_v6 = vld [vmem:[%s568_s20 + $0x28] sm:$0xff]  ;;  %v197_v7 = vmul.f32 %v429_v0, %v174_v1  ;;  %v198_v8 = vmul.f32 %v429_v0, %v175_v2  ;;  %v199_v10 = vmul.f32 %v429_v0, %v176_v3 }
  0x12   : > { %v180_v9 = vld [vmem:[%s568_s20 + $0x30] sm:$0xff]  ;;  %v200_v11 = vmul.f32 %v429_v0, %v177_v4  ;;  %v181_v13 = vld [vmem:[%s568_s20 + $0x38] sm:$0xff]  ;;  %v201_v14 = vmul.f32 %v429_v0, %v178_v5  ;;  %v182_v15 = vld [vmem:[%s568_s20 + $0x40] sm:$0xff]  ;;  %v202_v16 = vmul.f32 %v429_v0, %v179_v6 }
  0x13   : > { %v183_v17 = vld [vmem:[%s568_s20 + $0x48] sm:$0xff]  ;;  %v203_v18 = vmul.f32 %v429_v0, %v180_v9  ;;  %v583_v19 = vadd.f32 %v430_v12, %v197_v7  ;;  %v585_v20 = vadd.f32 %v430_v12, %v198_v8  ;;  %v184_v21 = vld [vmem:[%s568_s20 + $0x50] sm:$0xff]  ;;  %v204_v22 = vmul.f32 %v429_v0, %v181_v13  ;;  %v185_v25 = vld [vmem:[%s568_s20 + $0x58] sm:$0xff] }
  0x14   : > { %v588_v23 = vadd.f32 %v430_v12, %v199_v10  ;;  %v590_v24 = vadd.f32 %v430_v12, %v200_v11  ;;  %v205_v26 = vmul.f32 %v429_v0, %v182_v15  ;;  %v593_v27 = vadd.f32 %v430_v12, %v201_v14  ;;  %v186_v28 = vld [vmem:[%s568_s20 + $0x60] sm:$0xff]  ;;  %v187_v31 = vld [vmem:[%s568_s20 + $0x68] sm:$0xff]  ;;  %v188_v36 = vld [vmem:[%s568_s20 + $0x70] sm:$0xff] }
  0x15   : > { %v206_v29 = vmul.f32 %v429_v0, %v183_v17  ;;  %v596_v30 = vadd.f32 %v430_v12, %v202_v16  ;;  %v207_v32 = vmul.f32 %v429_v0, %v184_v21  ;;  %v599_v33 = vadd.f32 %v430_v12, %v203_v18  ;;  %v189_v41 = vld [vmem:[%s568_s20 + $0x78] sm:$0xff] }
  0x16   : > { %v431_v34 = vmul.f32 -1.442695, %v583_v19  ;;  %v432_v35 = vmul.f32 -1.442695, %v585_v20  ;;  %v208_v37 = vmul.f32 %v429_v0, %v185_v25  ;;  %v604_v38 = vadd.f32 %v430_v12, %v204_v22 }
  0x17   : > { %v433_v39 = vmul.f32 -1.442695, %v588_v23  ;;  %v434_v40 = vmul.f32 -1.442695, %v590_v24  ;;  %v209_v42 = vmul.f32 %v429_v0, %v186_v28  ;;  %v609_v43 = vadd.f32 %v430_v12, %v205_v26 }
  0x18   : > { %457 = vpow2.f32 %v431_v34  ;;  %v435_v44 = vmul.f32 -1.442695, %v593_v27  ;;  %v210_v45 = vmul.f32 %v429_v0, %v187_v31  ;;  %v612_v46 = vadd.f32 %v430_v12, %v206_v29 }
  0x19   : > { %459 = vpow2.f32 %v432_v35  ;;  %v436_v47 = vmul.f32 -1.442695, %v596_v30  ;;  %v211_v48 = vmul.f32 %v429_v0, %v188_v36  ;;  %v615_v49 = vadd.f32 %v430_v12, %v207_v32 }
  0x1a   : > { %461 = vpow2.f32 %v433_v39  ;;  %v437_v50 = vmul.f32 -1.442695, %v599_v33  ;;  %v212_v51 = vmul.f32 %v429_v0, %v189_v41  ;;  %v618_v52 = vadd.f32 %v430_v12, %v208_v37 }
  0x1b   : > { %463 = vpow2.f32 %v434_v40  ;;  %v438_v53 = vmul.f32 -1.442695, %v604_v38  ;;  %v621_v54 = vadd.f32 %v430_v12, %v209_v42  ;;  %v439_v55 = vmul.f32 -1.442695, %v609_v43 }
  0x1c   : > { %465 = vpow2.f32 %v435_v44  ;;  %v624_v56 = vadd.f32 %v430_v12, %v210_v45  ;;  %v440_v57 = vmul.f32 -1.442695, %v612_v46  ;;  %v627_v58 = vadd.f32 %v430_v12, %v211_v48 }
  0x1d   : > { %467 = vpow2.f32 %v436_v47  ;;  %v441_v59 = vmul.f32 -1.442695, %v615_v49  ;;  %v630_v60 = vadd.f32 %v430_v12, %v212_v51  ;;  %v442_v61 = vmul.f32 -1.442695, %v618_v52 }
  0x1e   : > { %469 = vpow2.f32 %v437_v50  ;;  %v443_v62 = vmul.f32 -1.442695, %v621_v54  ;;  %v444_v63 = vmul.f32 -1.442695, %v624_v56  ;;  %v445_v1 = vmul.f32 -1.442695, %v627_v58 }
  0x1f   : > { %471 = vpow2.f32 %v438_v53  ;;  %v446_v3 = vmul.f32 -1.442695, %v630_v60 }
  0x20   : > { %473 = vpow2.f32 %v439_v55 }
  0x21   : > { %475 = vpow2.f32 %v440_v57 }
  0x22   : > { %v458_v0 = vpop.eup %457  ;;  %477 = vpow2.f32 %v441_v59 }
  0x23   : > { %v460_v2 = vpop.eup %459  ;;  %479 = vpow2.f32 %v442_v61  ;;  %v284_v5 = vadd.f32 1.0, %v458_v0 }
  0x24   : > { %v462_v4 = vpop.eup %461  ;;  %481 = vpow2.f32 %v443_v62  ;;  %v285_v7 = vadd.f32 1.0, %v460_v2 }
  0x25   : > { %v464_v6 = vpop.eup %463  ;;  %483 = vpow2.f32 %v444_v63  ;;  %v286_v9 = vadd.f32 1.0, %v462_v4 }
  0x26   : > { %v466_v8 = vpop.eup %465  ;;  %485 = vpow2.f32 %v445_v1  ;;  %v287_v11 = vadd.f32 1.0, %v464_v6 }
  0x27   : > { %v468_v10 = vpop.eup %467  ;;  %487 = vpow2.f32 %v446_v3  ;;  %v288_v13 = vadd.f32 1.0, %v466_v8 }
  0x28   : > { %v470_v12 = vpop.eup %469  ;;  %489 = vrcp.f32 %v284_v5  ;;  %v289_v15 = vadd.f32 1.0, %v468_v10 }
  0x29   : > { %v472_v14 = vpop.eup %471  ;;  %491 = vrcp.f32 %v285_v7  ;;  %v290_v17 = vadd.f32 1.0, %v470_v12 }
  0x2a   : > { %v474_v16 = vpop.eup %473  ;;  %493 = vrcp.f32 %v286_v9  ;;  %v291_v21 = vadd.f32 1.0, %v472_v14 }
  0x2b   : > { %v476_v18 = vpop.eup %475  ;;  %495 = vrcp.f32 %v287_v11  ;;  %v292_v25 = vadd.f32 1.0, %v474_v16 }
  0x2c   : > { %v478_v22 = vpop.eup %477  ;;  %497 = vrcp.f32 %v288_v13  ;;  %v293_v28 = vadd.f32 1.0, %v476_v18 }
  0x2d   : > { %v480_v26 = vpop.eup %479  ;;  %499 = vrcp.f32 %v289_v15  ;;  %v294_v31 = vadd.f32 1.0, %v478_v22 }
  0x2e   : > { %v482_v29 = vpop.eup %481  ;;  %501 = vrcp.f32 %v290_v17  ;;  %v295_v34 = vadd.f32 1.0, %v480_v26 }
  0x2f   : > { %v484_v32 = vpop.eup %483  ;;  %503 = vrcp.f32 %v291_v21  ;;  %v296_v36 = vadd.f32 1.0, %v482_v29 }
  0x30   : > { %v486_v35 = vpop.eup %485  ;;  %505 = vrcp.f32 %v292_v25  ;;  %v297_v39 = vadd.f32 1.0, %v484_v32 }
  0x31   : > { %v488_v37 = vpop.eup %487  ;;  %507 = vrcp.f32 %v293_v28  ;;  %v298_v41 = vadd.f32 1.0, %v486_v35 }
  0x32   : > { %v490_v40 = vpop.eup %489  ;;  %509 = vrcp.f32 %v294_v31  ;;  %v299_v44 = vadd.f32 1.0, %v488_v37 }
  0x33   : > { %v492_v42 = vpop.eup %491  ;;  %511 = vrcp.f32 %v295_v34  ;;  %v332_v45 = vmul.f32 %v490_v40, %v583_v19 }
  0x34   : > { %v494_v47 = vpop.eup %493  ;;  %513 = vrcp.f32 %v296_v36  ;;  %v333_v48 = vmul.f32 %v492_v42, %v585_v20 }
  0x35   : > { %v496_v50 = vpop.eup %495  ;;  %515 = vrcp.f32 %v297_v39  ;;  %v334_v51 = vmul.f32 %v494_v47, %v588_v23  ;;  %348 = vst [vmem:[%s642_s25] sm:$0xff] %v332_v45 }
  0x36   : > { %v498_v53 = vpop.eup %497  ;;  %517 = vrcp.f32 %v298_v41  ;;  %v335_v55 = vmul.f32 %v496_v50, %v590_v24  ;;  %349 = vst [vmem:[%s642_s25 + $0x8] sm:$0xff] %v333_v48 }
  0x37   : > { %v500_v57 = vpop.eup %499  ;;  %519 = vrcp.f32 %v299_v44  ;;  %v336_v19 = vmul.f32 %v498_v53, %v593_v27  ;;  %350 = vst [vmem:[%s642_s25 + $0x10] sm:$0xff] %v334_v51 }
  0x38   : > { %v502_v20 = vpop.eup %501  ;;  %v337_v59 = vmul.f32 %v500_v57, %v596_v30  ;;  %351 = vst [vmem:[%s642_s25 + $0x18] sm:$0xff] %v335_v55 }
  0x39   : > { %v504_v23 = vpop.eup %503  ;;  %v338_v61 = vmul.f32 %v502_v20, %v599_v33  ;;  %352 = vst [vmem:[%s642_s25 + $0x20] sm:$0xff] %v336_v19 }
  0x3a   : > { %v506_v62 = vpop.eup %505  ;;  %v339_v24 = vmul.f32 %v504_v23, %v604_v38  ;;  %353 = vst [vmem:[%s642_s25 + $0x28] sm:$0xff] %v337_v59 }
  0x3b   : > { %v508_v63 = vpop.eup %507  ;;  %v340_v27 = vmul.f32 %v506_v62, %v609_v43  ;;  %354 = vst [vmem:[%s642_s25 + $0x30] sm:$0xff] %v338_v61 }
  0x3c   : > { %v510_v0 = vpop.eup %509  ;;  %v341_v30 = vmul.f32 %v508_v63, %v612_v46  ;;  %355 = vst [vmem:[%s642_s25 + $0x38] sm:$0xff] %v339_v24 }
  0x3d   : > { %v512_v1 = vpop.eup %511  ;;  %v342_v33 = vmul.f32 %v510_v0, %v615_v49  ;;  %356 = vst [vmem:[%s642_s25 + $0x40] sm:$0xff] %v340_v27 }
  0x3e   : > { %v514_v38 = vpop.eup %513  ;;  %v343_v2 = vmul.f32 %v512_v1, %v618_v52  ;;  %357 = vst [vmem:[%s642_s25 + $0x48] sm:$0xff] %v341_v30 }
  0x3f   : > { %v516_v3 = vpop.eup %515  ;;  %v344_v43 = vmul.f32 %v514_v38, %v621_v54  ;;  %358 = vst [vmem:[%s642_s25 + $0x50] sm:$0xff] %v342_v33 }
  0x40   : > { %v518_v4 = vpop.eup %517  ;;  %v345_v46 = vmul.f32 %v516_v3, %v624_v56  ;;  %359 = vst [vmem:[%s642_s25 + $0x58] sm:$0xff] %v343_v2 }
  0x41   : > { %v520_v5 = vpop.eup %519  ;;  %v346_v6 = vmul.f32 %v518_v4, %v627_v58  ;;  %360 = vst [vmem:[%s642_s25 + $0x60] sm:$0xff] %v344_v43 }
  0x42   : > { %v347_v49 = vmul.f32 %v520_v5, %v630_v60  ;;  %361 = vst [vmem:[%s642_s25 + $0x68] sm:$0xff] %v345_v46 }
  0x43   : > { %362 = vst [vmem:[%s642_s25 + $0x70] sm:$0xff] %v346_v6 }
  0x44   : > { %363 = vst [vmem:[%s642_s25 + $0x78] sm:$0xff] %v347_v49 }
  0x45 PF: > { %s13_s12 = sadd.s32 1, %s527_s12  }
  0x46   : > { %p10_p4 = scmp.ge.s32.totalorder %s13_s12, 4  }
  0x48   :  { %12 = sbr.rel (!%p10_p4) target bundleno = 1 (0x1), region = 62 }

// kernel: net_forward.4
= control target key start
LH: loop header
LB: loop body
LE: loop exit
PB: predicated region body
PF: predicated region fallthrough
CT: control target
= control target key end

     0   :  { %s690_s12 = smov 0   ;;  %s786_s0 = inlined_call_operand.vmem [shape: f32[256,32], index: 0, kind: input, shape index: {}]   ;;  %s787_s1 = inlined_call_operand.vmem [shape: f32[32,128], index: 1, kind: input, shape index: {}]   ;;  %s788_s2 = inlined_call_operand.vmem [shape: f32[256,128], index: 2, kind: output, shape index: {0}]   ;;  %s789_s3 = inlined_call_operand.vmem [shape: f32[2,2,128], index: 3, kind: output, shape index: {1}]  }
   0x1 LB: > { %s696_s13 = sadd.s32 4294967295, %s668_s12   ;;  %p566_p0 = scmp.ge.s32.totalorder %s668_s12, 1  ;;  %s668_s12 = sphi %s690_s12, %s14_s12  }
   0x2   : > { %p141_p1 = scmp.lt.s32.totalorder %s668_s12, 3 }
   0x4   : > { %p142_p2 = pnand %p566_p0, %p141_p1 }
   0x5   : > { %v201_v0 = vld [vmem:[%s787_s1] sm:$0xff] (!%p142_p2)  ;;  %v202_v1 = vld [vmem:[%s787_s1 + $0x8] sm:$0xff] (!%p142_p2)  ;;  %v203_v2 = vld [vmem:[%s787_s1 + $0x10] sm:$0xff] (!%p142_p2)  ;;  %s567_s20 = sshll.u32 (!%p142_p2), %s696_s13, 4  ;;  %vm205_vm0 = vcmask (!%p142_p2), 261120   ;;  %p181_p4 = scmp.lt.s32.totalorder (!%p142_p2), %s696_s13, 1 }
   0x6   : > { %145 = sbr.rel (%p142_p2) target bundleno = 278 (0x116), region = 28  ;;  %v642_v3 = vpack.c.bf16 (!%p142_p2), %v202_v1, %v201_v0  ;;  %v204_v4 = vld [vmem:[%s787_s1 + $0x18] sm:$0xff] (!%p142_p2)  ;;  %p170_p3 = scmp.lt.s32.totalorder (!%p142_p2), %s567_s20, 31 }
   0x7   : > { %v646_v5 = vpack.c.bf16 (!%p142_p2), %v204_v4, %v203_v2 }
   0x8   : > { %643 = vmatprep.subr.bf16.mxu0 (!%p142_p2), %v642_v3  ;;  %650 = vmatprep.subr.bf16.mxu1 (!%p142_p2), %v642_v3 }
   0x9   : > { %645 = vmatpush3.bf16.msra.mxu0 (!%p142_p2), %v642_v3  ;;  %652 = vmatpush3.bf16.msra.mxu1 (!%p142_p2), %v642_v3 }
   0xa   : > { %647 = vmatprep.subr.bf16.mxu0 (!%p142_p2), %v646_v5  ;;  %651 = vmatprep.subr.bf16.mxu1 (!%p142_p2), %v646_v5 }
   0xd   : > { %s791_s20 = smov (!%p170_p3, %s567_s20), 31  ;;  %649 = vmatpush3.bf16.msra.mxu0 %v646_v5  ;;  %653 = vmatpush3.bf16.msra.mxu1 %v646_v5  ;;  %s793_s13 = smov (!%p181_p4, %s696_s13), 1 }
   0xe   : > { %s568_s23 = sshll.u32 %s791_s20, 3  ;;  %s571_s30 = sshll.u32 %s793_s13, 1 }
   0xf   : > { %s721_s26 = scalar_lea.vmem %s786_s0, %s568_s23  ;;  %s760_s29 = scalar_lea.vmem %s788_s2, %s568_s23 }
  0x10   : > { %v185_v6 = vld [vmem:[%s721_s26] sm:$0xff]  ;;  %v186_v7 = vld [vmem:[%s721_s26 + $0x8] sm:$0xff]  ;;  %v187_v8 = vld [vmem:[%s721_s26 + $0x10] sm:$0xff]  ;;  %s184_s6 = scalar_lea.vmem %s789_s3, %s571_s30 }
  0x11   : > { %618 = vmatprep.mubr.msk.f32.mxu0 %vm205_vm0, %v185_v6  ;;  %v193_v9 = vld [vmem:[%s721_s26 + $0x40] sm:$0xff]  ;;  %v194_v10 = vld [vmem:[%s721_s26 + $0x48] sm:$0xff]  ;;  %v195_v11 = vld [vmem:[%s721_s26 + $0x50] sm:$0xff] }
  0x12   : > { %630 = vmatprep.mubr.msk.f32.mxu1 %vm205_vm0, %v193_v9  ;;  %619 = vmatmul.mubr.msk.f32.vlgmr.msra.gmra.mrb[0].mxu0 %vm205_vm0, %v186_v7  ;;  %v188_v12 = vld [vmem:[%s721_s26 + $0x18] sm:$0xff]  ;;  %v189_v13 = vld [vmem:[%s721_s26 + $0x20] sm:$0xff]  ;;  %v190_v16 = vld [vmem:[%s721_s26 + $0x28] sm:$0xff] }
  0x13   : > { %621 = vmatprep.mubr.msk.f32.mxu0 %vm205_vm0, %v187_v8  ;;  %631 = vmatmul.mubr.msk.f32.vlgmr.msra.gmra.mrb[0].mxu1 %vm205_vm0, %v194_v10  ;;  %v196_v14 = vld [vmem:[%s721_s26 + $0x58] sm:$0xff]  ;;  %v197_v15 = vld [vmem:[%s721_s26 + $0x60] sm:$0xff]  ;;  %v191_v17 = vld [vmem:[%s721_s26 + $0x30] sm:$0xff] }
  0x14   : > { %633 = vmatprep.mubr.msk.f32.mxu1 %vm205_vm0, %v195_v11  ;;  %v198_v18 = vld [vmem:[%s721_s26 + $0x68] sm:$0xff]  ;;  %v199_v19 = vld [vmem:[%s721_s26 + $0x70] sm:$0xff]  ;;  %v192_v20 = vld [vmem:[%s721_s26 + $0x38] sm:$0xff] }
  0x15   : > { %v200_v21 = vld [vmem:[%s721_s26 + $0x78] sm:$0xff] }
  0x16   : > { %622 = vmatmul.mubr.msk.f32.gmra.mrb[2].mxu0 %vm205_vm0, %v188_v12 }
  0x17   : > { %624 = vmatprep.mubr.msk.f32.mxu0 %vm205_vm0, %v189_v13  ;;  %634 = vmatmul.mubr.msk.f32.gmra.mrb[2].mxu1 %vm205_vm0, %v196_v14 }
  0x18   : > { %636 = vmatprep.mubr.msk.f32.mxu1 %vm205_vm0, %v197_v15 }
  0x1a   : > { %625 = vmatmul.mubr.msk.f32.gmra.mrb[4].mxu0 %vm205_vm0, %v190_v16 }
  0x1b   : > { %627 = vmatprep.mubr.msk.f32.mxu0 %vm205_vm0, %v191_v17  ;;  %637 = vmatmul.mubr.msk.f32.gmra.mrb[4].mxu1 %vm205_vm0, %v198_v18 }
  0x1c   : > { %639 = vmatprep.mubr.msk.f32.mxu1 %vm205_vm0, %v199_v19 }
  0x1e   : > { %628 = vmatmul.mubr.msk.f32.gmra.mrb[6].mxu0 %vm205_vm0, %v192_v20 }
  0x1f   : > { %640 = vmatmul.mubr.msk.f32.gmra.mrb[6].mxu1 %vm205_vm0, %v200_v21 }
  0xe5   : > { %v620_v22 = vpop.f32.mrb[0].mxu0 }
  0xe6   : > { %400 = vst [vmem:[%s760_s29 + $0x8] sm:$0xff] %v620_v22  ;;  %v438_v23 = vmul.f32 %v620_v22, %v620_v22  ;;  %v320_v24 = vpop.f32.mrb[1].mxu0  ;;  %v632_v25 = vpop.f32.mrb[0].mxu1 }
  0xe7   : > { %399 = vst [vmem:[%s760_s29] sm:$0xff] %v320_v24  ;;  %v415_v26 = vadd.f32 %v620_v22, %v320_v24  ;;  %v437_v27 = vmul.f32 %v320_v24, %v320_v24  ;;  %408 = vst [vmem:[%s760_s29 + $0x48] sm:$0xff] %v632_v25  ;;  %v360_v28 = vpop.f32.mrb[1].mxu1  ;;  %v446_v62 = vmul.f32 %v632_v25, %v632_v25 }
  0xe8   : > { %407 = vst [vmem:[%s760_s29 + $0x40] sm:$0xff] %v360_v28  ;;  %v445_v59 = vmul.f32 %v360_v28, %v360_v28 }
  0xe9   : > { %v453_v29 = vadd.f32 %v438_v23, %v437_v27  ;;  %v623_v30 = vpop.f32.mrb[2].mxu0 }
  0xea   : > { %402 = vst [vmem:[%s760_s29 + $0x18] sm:$0xff] %v623_v30  ;;  %v330_v31 = vpop.f32.mrb[3].mxu0  ;;  %v635_v32 = vpop.f32.mrb[2].mxu1  ;;  %v440_v36 = vmul.f32 %v623_v30, %v623_v30 }
  0xeb   : > { %401 = vst [vmem:[%s760_s29 + $0x10] sm:$0xff] %v330_v31  ;;  %v416_v33 = vadd.f32 %v415_v26, %v330_v31  ;;  %v439_v34 = vmul.f32 %v330_v31, %v330_v31  ;;  %410 = vst [vmem:[%s760_s29 + $0x58] sm:$0xff] %v635_v32  ;;  %v370_v35 = vpop.f32.mrb[3].mxu1  ;;  %v448_v4 = vmul.f32 %v635_v32, %v635_v32 }
  0xec   : > { %409 = vst [vmem:[%s760_s29 + $0x50] sm:$0xff] %v370_v35  ;;  %v447_v1 = vmul.f32 %v370_v35, %v370_v35 }
  0xed   : > { %v454_v37 = vadd.f32 %v453_v29, %v439_v34  ;;  %v626_v38 = vpop.f32.mrb[4].mxu0  ;;  %v417_v39 = vadd.f32 %v623_v30, %v416_v33 }
  0xee   : > { %404 = vst [vmem:[%s760_s29 + $0x28] sm:$0xff] %v626_v38  ;;  %v340_v40 = vpop.f32.mrb[5].mxu0  ;;  %v638_v41 = vpop.f32.mrb[4].mxu1  ;;  %v442_v46 = vmul.f32 %v626_v38, %v626_v38 }
  0xef   : > { %403 = vst [vmem:[%s760_s29 + $0x20] sm:$0xff] %v340_v40  ;;  %v418_v42 = vadd.f32 %v417_v39, %v340_v40  ;;  %v441_v43 = vmul.f32 %v340_v40, %v340_v40  ;;  %v455_v44 = vadd.f32 %v454_v37, %v440_v36  ;;  %412 = vst [vmem:[%s760_s29 + $0x68] sm:$0xff] %v638_v41  ;;  %v380_v45 = vpop.f32.mrb[5].mxu1 }
  0xf0   : > { %411 = vst [vmem:[%s760_s29 + $0x60] sm:$0xff] %v380_v45  ;;  %v449_v7 = vmul.f32 %v380_v45, %v380_v45  ;;  %v450_v10 = vmul.f32 %v638_v41, %v638_v41 }
  0xf1   : > { %v456_v47 = vadd.f32 %v455_v44, %v441_v43  ;;  %v629_v48 = vpop.f32.mrb[6].mxu0  ;;  %v419_v49 = vadd.f32 %v626_v38, %v418_v42 }
  0xf2   : > { %406 = vst [vmem:[%s760_s29 + $0x38] sm:$0xff] %v629_v48  ;;  %v350_v50 = vpop.f32.mrb[7].mxu0  ;;  %v641_v51 = vpop.f32.mrb[6].mxu1  ;;  %v444_v56 = vmul.f32 %v629_v48, %v629_v48 }
  0xf3   : > { %405 = vst [vmem:[%s760_s29 + $0x30] sm:$0xff] %v350_v50  ;;  %v420_v52 = vadd.f32 %v419_v49, %v350_v50  ;;  %v443_v53 = vmul.f32 %v350_v50, %v350_v50  ;;  %v457_v54 = vadd.f32 %v456_v47, %v442_v46  ;;  %414 = vst [vmem:[%s760_s29 + $0x78] sm:$0xff] %v641_v51  ;;  %v390_v55 = vpop.f32.mrb[7].mxu1 }
  0xf4   : > { %413 = vst [vmem:[%s760_s29 + $0x70] sm:$0xff] %v390_v55  ;;  %v451_v13 = vmul.f32 %v390_v55, %v390_v55  ;;  %v452_v16 = vmul.f32 %v641_v51, %v641_v51 }
  0xf5   : > { %v421_v57 = vadd.f32 %v629_v48, %v420_v52  ;;  %v458_v58 = vadd.f32 %v457_v54, %v443_v53 }
  0xf7   : > { %v459_v60 = vadd.f32 %v458_v58, %v444_v56  ;;  %v422_v61 = vadd.f32 %v421_v57, %v360_v28 }
  0xf9   : > { %v460_v63 = vadd.f32 %v459_v60, %v445_v59  ;;  %v423_v0 = vadd.f32 %v632_v25, %v422_v61 }
  0xfb   : > { %v424_v2 = vadd.f32 %v423_v0, %v370_v35  ;;  %v461_v3 = vadd.f32 %v460_v63, %v446_v62 }
  0xfd   : > { %v462_v5 = vadd.f32 %v461_v3, %v447_v1  ;;  %v425_v6 = vadd.f32 %v635_v32, %v424_v2 }
  0xff   : > { %v426_v8 = vadd.f32 %v425_v6, %v380_v45  ;;  %v463_v9 = vadd.f32 %v462_v5, %v448_v4 }
 0x101   : > { %v464_v11 = vadd.f32 %v463_v9, %v449_v7  ;;  %v427_v12 = vadd.f32 %v638_v41, %v426_v8 }
 0x103   : > { %v428_v14 = vadd.f32 %v427_v12, %v390_v55  ;;  %v465_v15 = vadd.f32 %v464_v11, %v450_v10 }
 0x105   : > { %v429_v17 = vadd.f32 %v641_v51, %v428_v14  ;;  %v466_v18 = vadd.f32 %v465_v15, %v451_v13 }
 0x107   : > { %v430_v19 = vrot.slane %v429_v17, 4  ;;  %v467_v20 = vadd.f32 %v466_v18, %v452_v16 }
 0x109   : > { %v431_v21 = vadd.f32 %v430_v19, %v429_v17  ;;  %v468_v22 = vrot.slane %v467_v20, 4 }
 0x10b   : > { %v432_v23 = vrot.slane %v431_v21, 2  ;;  %v469_v24 = vadd.f32 %v468_v22, %v467_v20 }
 0x10d   : > { %v433_v25 = vadd.f32 %v432_v23, %v431_v21  ;;  %v470_v26 = vrot.slane %v469_v24, 2 }
 0x10f   : > { %v434_v27 = vrot.slane %v433_v25, 1  ;;  %v471_v28 = vadd.f32 %v470_v26, %v469_v24 }
 0x111   : > { %v435_v29 = vadd.f32 %v434_v27, %v433_v25  ;;  %v472_v30 = vrot.slane %v471_v28, 1 }
 0x113   : > { %436 = vst [vmem:[%s184_s6] sm:$0x1] %v435_v29  ;;  %v473_v31 = vadd.f32 %v472_v30, %v471_v28 }
 0x115   : > { %474 = vst [vmem:[%s184_s6 + $0x1] sm:$0x1] %v473_v31 }
 0x116 PF: > { %s14_s12 = sadd.s32 1, %s668_s12  }
 0x117   : > { %p11_p5 = scmp.ge.s32.totalorder %s14_s12, 4  }
 0x119   :  { %13 = sbr.rel (!%p11_p5) target bundleno = 1 (0x1), region = 70 }

// kernel: net_forward.6
= control target key start
LH: loop header
LB: loop body
LE: loop exit
PB: predicated region body
PF: predicated region fallthrough
CT: control target
= control target key end

     0   :  { %s709_s12 = smov 0   ;;  %s825_s0 = inlined_call_operand.vmem [shape: f32[256,128], index: 0, kind: input, shape index: {}]   ;;  %s826_s1 = inlined_call_operand.vmem [shape: f32[128,128], index: 1, kind: input, shape index: {}]   ;;  %s827_s2 = inlined_call_operand.vmem [shape: f32[256,128], index: 2, kind: output, shape index: {0}]   ;;  %s828_s3 = inlined_call_operand.vmem [shape: f32[2,2,128], index: 3, kind: output, shape index: {1}]  }
   0x1 LB: > { %s715_s13 = sadd.s32 4294967295, %s687_s12   ;;  %p529_p0 = scmp.ge.s32.totalorder %s687_s12, 1  ;;  %s687_s12 = sphi %s709_s12, %s14_s12  }
   0x2   : > { %p141_p1 = scmp.lt.s32.totalorder %s687_s12, 3 }
   0x4   : > { %p142_p2 = pnand %p529_p0, %p141_p1 }
   0x5   : > { %v201_v0 = vld [vmem:[%s826_s1] sm:$0xff] (!%p142_p2)  ;;  %v202_v1 = vld [vmem:[%s826_s1 + $0x8] sm:$0xff] (!%p142_p2)  ;;  %v203_v2 = vld [vmem:[%s826_s1 + $0x10] sm:$0xff] (!%p142_p2)  ;;  %s530_s20 = sshll.u32 (!%p142_p2), %s715_s13, 4  ;;  %p181_p4 = scmp.lt.s32.totalorder (!%p142_p2), %s715_s13, 1 }
   0x6   : > { %145 = sbr.rel (%p142_p2) target bundleno = 300 (0x12c), region = 28  ;;  %v625_v3 = vpack.c.bf16 (!%p142_p2), %v202_v1, %v201_v0  ;;  %v204_v4 = vld [vmem:[%s826_s1 + $0x18] sm:$0xff] (!%p142_p2)  ;;  %p170_p3 = scmp.lt.s32.totalorder (!%p142_p2), %s530_s20, 31  ;;  %v205_v6 = vld [vmem:[%s826_s1 + $0x20] sm:$0xff] (!%p142_p2)  ;;  %v206_v7 = vld [vmem:[%s826_s1 + $0x28] sm:$0xff] (!%p142_p2) }
   0x7   : > { %v629_v5 = vpack.c.bf16 (!%p142_p2), %v204_v4, %v203_v2  ;;  %v633_v8 = vpack.c.bf16 (!%p142_p2), %v206_v7, %v205_v6  ;;  %v207_v9 = vld [vmem:[%s826_s1 + $0x30] sm:$0xff] (!%p142_p2)  ;;  %v208_v10 = vld [vmem:[%s826_s1 + $0x38] sm:$0xff] (!%p142_p2)  ;;  %v209_v14 = vld [vmem:[%s826_s1 + $0x40] sm:$0xff] (!%p142_p2) }
   0x8   : > { %626 = vmatprep.subr.bf16.mxu0 (!%p142_p2), %v625_v3  ;;  %657 = vmatprep.subr.bf16.mxu1 (!%p142_p2), %v625_v3  ;;  %v637_v12 = vpack.c.bf16 (!%p142_p2), %v208_v10, %v207_v9  ;;  %v210_v15 = vld [vmem:[%s826_s1 + $0x48] sm:$0xff] (!%p142_p2)  ;;  %v211_v17 = vld [vmem:[%s826_s1 + $0x50] sm:$0xff] (!%p142_p2)  ;;  %v212_v18 = vld [vmem:[%s826_s1 + $0x58] sm:$0xff] (!%p142_p2) }
   0x9   : > { %628 = vmatpush3.bf16.msra.mxu0 (!%p142_p2), %v625_v3  ;;  %665 = vmatpush3.bf16.msra.mxu1 (!%p142_p2), %v625_v3  ;;  %v641_v16 = vpack.c.bf16 (!%p142_p2), %v210_v15, %v209_v14  ;;  %v645_v19 = vpack.c.bf16 (!%p142_p2), %v212_v18, %v211_v17  ;;  %v213_v20 = vld [vmem:[%s826_s1 + $0x60] sm:$0xff] (!%p142_p2)  ;;  %v214_v21 = vld [vmem:[%s826_s1 + $0x68] sm:$0xff] (!%p142_p2)  ;;  %v215_v23 = vld [vmem:[%s826_s1 + $0x70] sm:$0xff] (!%p142_p2) }
   0xa   : > { %630 = vmatprep.subr.bf16.mxu0 (!%p142_p2), %v629_v5  ;;  %658 = vmatprep.subr.bf16.mxu1 (!%p142_p2), %v629_v5  ;;  %v649_v22 = vpack.c.bf16 (!%p142_p2), %v214_v21, %v213_v20  ;;  %v216_v24 = vld [vmem:[%s826_s1 + $0x78] sm:$0xff] (!%p142_p2) }
   0xb   : > { %v653_v25 = vpack.c.bf16 (!%p142_p2), %v216_v24, %v215_v23 }
   0xd   : > { %s830_s20 = smov (!%p170_p3, %s530_s20), 31  ;;  %632 = vmatpush3.bf16.msra.mxu0 %v629_v5  ;;  %666 = vmatpush3.bf16.msra.mxu1 %v629_v5  ;;  %s832_s13 = smov (!%p181_p4, %s715_s13), 1 }
   0xe   : > { %s531_s27 = sshll.u32 %s830_s20, 3  ;;  %634 = vmatprep.subr.bf16.mxu0 %v633_v8  ;;  %659 = vmatprep.subr.bf16.mxu1 %v633_v8  ;;  %s534_s20 = sshll.u32 %s832_s13, 1 }
   0xf   : > { %s752_s7 = scalar_lea.vmem %s825_s0, %s531_s27  ;;  %s799_s30 = scalar_lea.vmem %s827_s2, %s531_s27 }
  0x10   : > { %v185_v11 = vld [vmem:[%s752_s7] sm:$0xff]  ;;  %v186_v26 = vld [vmem:[%s752_s7 + $0x8] sm:$0xff]  ;;  %v187_v28 = vld [vmem:[%s752_s7 + $0x10] sm:$0xff]  ;;  %s184_s5 = scalar_lea.vmem %s828_s3, %s534_s20 }
  0x11   : > { %v193_v13 = vld [vmem:[%s752_s7 + $0x40] sm:$0xff]  ;;  %601 = vmatprep.mubr.f32.mxu0 %v185_v11  ;;  %636 = vmatpush3.bf16.msra.mxu0 %v633_v8  ;;  %v194_v27 = vld [vmem:[%s752_s7 + $0x48] sm:$0xff]  ;;  %v195_v29 = vld [vmem:[%s752_s7 + $0x50] sm:$0xff] }
  0x12   : > { %613 = vmatprep.mubr.f32.mxu1 %v193_v13  ;;  %667 = vmatpush3.bf16.msra.mxu1 %v633_v8  ;;  %v188_v30 = vld [vmem:[%s752_s7 + $0x18] sm:$0xff]  ;;  %v189_v32 = vld [vmem:[%s752_s7 + $0x20] sm:$0xff]  ;;  %v190_v34 = vld [vmem:[%s752_s7 + $0x28] sm:$0xff] }
  0x13   : > { %638 = vmatprep.subr.bf16.mxu0 %v637_v12  ;;  %660 = vmatprep.subr.bf16.mxu1 %v637_v12  ;;  %v196_v31 = vld [vmem:[%s752_s7 + $0x58] sm:$0xff]  ;;  %v197_v33 = vld [vmem:[%s752_s7 + $0x60] sm:$0xff]  ;;  %v198_v35 = vld [vmem:[%s752_s7 + $0x68] sm:$0xff] }
  0x14   : > { %v191_v36 = vld [vmem:[%s752_s7 + $0x30] sm:$0xff]  ;;  %v192_v38 = vld [vmem:[%s752_s7 + $0x38] sm:$0xff] }
  0x15   : > { %640 = vmatpush3.bf16.msra.mxu0 %v637_v12  ;;  %v199_v37 = vld [vmem:[%s752_s7 + $0x70] sm:$0xff]  ;;  %v200_v39 = vld [vmem:[%s752_s7 + $0x78] sm:$0xff] }
  0x16   : > { %668 = vmatpush3.bf16.msra.mxu1 %v637_v12  ;;  %642 = vmatprep.subr.bf16.mxu0 %v641_v16 }
  0x17   : > { %661 = vmatprep.subr.bf16.mxu1 %v641_v16 }
  0x19   : > { %644 = vmatpush3.bf16.msra.mxu0 %v641_v16 }
  0x1a   : > { %669 = vmatpush3.bf16.msra.mxu1 %v641_v16  ;;  %646 = vmatprep.subr.bf16.mxu0 %v645_v19 }
  0x1b   : > { %662 = vmatprep.subr.bf16.mxu1 %v645_v19 }
  0x1d   : > { %648 = vmatpush3.bf16.msra.mxu0 %v645_v19 }
  0x1e   : > { %670 = vmatpush3.bf16.msra.mxu1 %v645_v19  ;;  %650 = vmatprep.subr.bf16.mxu0 %v649_v22 }
  0x1f   : > { %663 = vmatprep.subr.bf16.mxu1 %v649_v22 }
  0x21   : > { %652 = vmatpush3.bf16.msra.mxu0 %v649_v22 }
  0x22   : > { %671 = vmatpush3.bf16.msra.mxu1 %v649_v22  ;;  %654 = vmatprep.subr.bf16.mxu0 %v653_v25 }
  0x23   : > { %664 = vmatprep.subr.bf16.mxu1 %v653_v25 }
  0x25   : > { %656 = vmatpush3.bf16.msra.mxu0 %v653_v25 }
  0x26   : > { %672 = vmatpush3.bf16.msra.mxu1 %v653_v25 }
  0x28   : > { %602 = vmatmul.mubr.f32.vlgmr.msra.gmra.mrb[0].mxu0 %v186_v26 }
  0x29   : > { %614 = vmatmul.mubr.f32.vlgmr.msra.gmra.mrb[0].mxu1 %v194_v27  ;;  %604 = vmatprep.mubr.f32.mxu0 %v187_v28 }
  0x2a   : > { %616 = vmatprep.mubr.f32.mxu1 %v195_v29 }
  0x2c   : > { %605 = vmatmul.mubr.f32.gmra.mrb[2].mxu0 %v188_v30 }
  0x2d   : > { %617 = vmatmul.mubr.f32.gmra.mrb[2].mxu1 %v196_v31  ;;  %607 = vmatprep.mubr.f32.mxu0 %v189_v32 }
  0x2e   : > { %619 = vmatprep.mubr.f32.mxu1 %v197_v33 }
  0x30   : > { %608 = vmatmul.mubr.f32.gmra.mrb[4].mxu0 %v190_v34 }
  0x31   : > { %620 = vmatmul.mubr.f32.gmra.mrb[4].mxu1 %v198_v35  ;;  %610 = vmatprep.mubr.f32.mxu0 %v191_v36 }
  0x32   : > { %622 = vmatprep.mubr.f32.mxu1 %v199_v37 }
  0x34   : > { %611 = vmatmul.mubr.f32.gmra.mrb[6].mxu0 %v192_v38 }
  0x35   : > { %623 = vmatmul.mubr.f32.gmra.mrb[6].mxu1 %v200_v39 }
  0xfb   : > { %v603_v40 = vpop.f32.mrb[0].mxu0 }
  0xfc   : > { %v615_v41 = vpop.f32.mrb[0].mxu1  ;;  %363 = vst [vmem:[%s799_s30 + $0x8] sm:$0xff] %v603_v40  ;;  %v401_v42 = vmul.f32 %v603_v40, %v603_v40  ;;  %v283_v43 = vpop.f32.mrb[1].mxu0 }
  0xfd   : > { %371 = vst [vmem:[%s799_s30 + $0x48] sm:$0xff] %v615_v41  ;;  %v323_v44 = vpop.f32.mrb[1].mxu1  ;;  %362 = vst [vmem:[%s799_s30] sm:$0xff] %v283_v43  ;;  %v378_v45 = vadd.f32 %v603_v40, %v283_v43  ;;  %v400_v46 = vmul.f32 %v283_v43, %v283_v43  ;;  %v409_v16 = vmul.f32 %v615_v41, %v615_v41 }
  0xfe   : > { %370 = vst [vmem:[%s799_s30 + $0x40] sm:$0xff] %v323_v44  ;;  %v408_v13 = vmul.f32 %v323_v44, %v323_v44 }
  0xff   : > { %v416_v47 = vadd.f32 %v401_v42, %v400_v46  ;;  %v606_v48 = vpop.f32.mrb[2].mxu0 }
 0x100   : > { %v618_v49 = vpop.f32.mrb[2].mxu1  ;;  %365 = vst [vmem:[%s799_s30 + $0x18] sm:$0xff] %v606_v48  ;;  %v293_v50 = vpop.f32.mrb[3].mxu0  ;;  %v403_v54 = vmul.f32 %v606_v48, %v606_v48 }
 0x101   : > { %373 = vst [vmem:[%s799_s30 + $0x58] sm:$0xff] %v618_v49  ;;  %v333_v51 = vpop.f32.mrb[3].mxu1  ;;  %364 = vst [vmem:[%s799_s30 + $0x10] sm:$0xff] %v293_v50  ;;  %v379_v52 = vadd.f32 %v378_v45, %v293_v50  ;;  %v402_v53 = vmul.f32 %v293_v50, %v293_v50  ;;  %v411_v22 = vmul.f32 %v618_v49, %v618_v49 }
 0x102   : > { %372 = vst [vmem:[%s799_s30 + $0x50] sm:$0xff] %v333_v51  ;;  %v410_v19 = vmul.f32 %v333_v51, %v333_v51 }
 0x103   : > { %v417_v55 = vadd.f32 %v416_v47, %v402_v53  ;;  %v609_v56 = vpop.f32.mrb[4].mxu0  ;;  %v380_v57 = vadd.f32 %v606_v48, %v379_v52 }
 0x104   : > { %v621_v58 = vpop.f32.mrb[4].mxu1  ;;  %367 = vst [vmem:[%s799_s30 + $0x28] sm:$0xff] %v609_v56  ;;  %v303_v59 = vpop.f32.mrb[5].mxu0  ;;  %v405_v0 = vmul.f32 %v609_v56, %v609_v56 }
 0x105   : > { %375 = vst [vmem:[%s799_s30 + $0x68] sm:$0xff] %v621_v58  ;;  %v343_v60 = vpop.f32.mrb[5].mxu1  ;;  %366 = vst [vmem:[%s799_s30 + $0x20] sm:$0xff] %v303_v59  ;;  %v381_v61 = vadd.f32 %v380_v57, %v303_v59  ;;  %v404_v62 = vmul.f32 %v303_v59, %v303_v59  ;;  %v418_v63 = vadd.f32 %v417_v55, %v403_v54 }
 0x106   : > { %374 = vst [vmem:[%s799_s30 + $0x60] sm:$0xff] %v343_v60  ;;  %v412_v25 = vmul.f32 %v343_v60, %v343_v60  ;;  %v413_v28 = vmul.f32 %v621_v58, %v621_v58 }
 0x107   : > { %v419_v1 = vadd.f32 %v418_v63, %v404_v62  ;;  %v612_v2 = vpop.f32.mrb[6].mxu0  ;;  %v382_v3 = vadd.f32 %v609_v56, %v381_v61 }
 0x108   : > { %v624_v4 = vpop.f32.mrb[6].mxu1  ;;  %369 = vst [vmem:[%s799_s30 + $0x38] sm:$0xff] %v612_v2  ;;  %v313_v5 = vpop.f32.mrb[7].mxu0  ;;  %v407_v10 = vmul.f32 %v612_v2, %v612_v2 }
 0x109   : > { %377 = vst [vmem:[%s799_s30 + $0x78] sm:$0xff] %v624_v4  ;;  %v353_v6 = vpop.f32.mrb[7].mxu1  ;;  %368 = vst [vmem:[%s799_s30 + $0x30] sm:$0xff] %v313_v5  ;;  %v383_v7 = vadd.f32 %v382_v3, %v313_v5  ;;  %v406_v8 = vmul.f32 %v313_v5, %v313_v5  ;;  %v420_v9 = vadd.f32 %v419_v1, %v405_v0 }
 0x10a   : > { %376 = vst [vmem:[%s799_s30 + $0x70] sm:$0xff] %v353_v6  ;;  %v414_v31 = vmul.f32 %v353_v6, %v353_v6  ;;  %v415_v34 = vmul.f32 %v624_v4, %v624_v4 }
 0x10b   : > { %v384_v11 = vadd.f32 %v612_v2, %v383_v7  ;;  %v421_v12 = vadd.f32 %v420_v9, %v406_v8 }
 0x10d   : > { %v422_v14 = vadd.f32 %v421_v12, %v407_v10  ;;  %v385_v15 = vadd.f32 %v384_v11, %v323_v44 }
 0x10f   : > { %v423_v17 = vadd.f32 %v422_v14, %v408_v13  ;;  %v386_v18 = vadd.f32 %v615_v41, %v385_v15 }
 0x111   : > { %v387_v20 = vadd.f32 %v386_v18, %v333_v51  ;;  %v424_v21 = vadd.f32 %v423_v17, %v409_v16 }
 0x113   : > { %v425_v23 = vadd.f32 %v424_v21, %v410_v19  ;;  %v388_v24 = vadd.f32 %v618_v49, %v387_v20 }
 0x115   : > { %v389_v26 = vadd.f32 %v388_v24, %v343_v60  ;;  %v426_v27 = vadd.f32 %v425_v23, %v411_v22 }
 0x117   : > { %v427_v29 = vadd.f32 %v426_v27, %v412_v25  ;;  %v390_v30 = vadd.f32 %v621_v58, %v389_v26 }
 0x119   : > { %v391_v32 = vadd.f32 %v390_v30, %v353_v6  ;;  %v428_v33 = vadd.f32 %v427_v29, %v413_v28 }
 0x11b   : > { %v392_v35 = vadd.f32 %v624_v4, %v391_v32  ;;  %v429_v36 = vadd.f32 %v428_v33, %v414_v31 }
 0x11d   : > { %v393_v37 = vrot.slane %v392_v35, 4  ;;  %v430_v38 = vadd.f32 %v429_v36, %v415_v34 }
 0x11f   : > { %v394_v39 = vadd.f32 %v393_v37, %v392_v35  ;;  %v431_v40 = vrot.slane %v430_v38, 4 }
 0x121   : > { %v395_v41 = vrot.slane %v394_v39, 2  ;;  %v432_v42 = vadd.f32 %v431_v40, %v430_v38 }
 0x123   : > { %v396_v43 = vadd.f32 %v395_v41, %v394_v39  ;;  %v433_v44 = vrot.slane %v432_v42, 2 }
 0x125   : > { %v397_v45 = vrot.slane %v396_v43, 1  ;;  %v434_v46 = vadd.f32 %v433_v44, %v432_v42 }
 0x127   : > { %v398_v47 = vadd.f32 %v397_v45, %v396_v43  ;;  %v435_v48 = vrot.slane %v434_v46, 1 }
 0x129   : > { %399 = vst [vmem:[%s184_s5] sm:$0x1] %v398_v47  ;;  %v436_v49 = vadd.f32 %v435_v48, %v434_v46 }
 0x12b   : > { %437 = vst [vmem:[%s184_s5 + $0x1] sm:$0x1] %v436_v49 }
 0x12c PF: > { %s14_s12 = sadd.s32 1, %s687_s12  }
 0x12d   : > { %p11_p5 = scmp.ge.s32.totalorder %s14_s12, 4  }
 0x12f   :  { %13 = sbr.rel (!%p11_p5) target bundleno = 1 (0x1), region = 70 }

// kernel: net_forward.7
= control target key start
LH: loop header
LB: loop body
LE: loop exit
PB: predicated region body
PF: predicated region fallthrough
CT: control target
= control target key end

     0   :  { %s918_s18 = smov 0   ;;  %s1141_s0 = inlined_call_operand.vmem [shape: f32[1,128], index: 0, kind: input, shape index: {}]   ;;  %s1142_s1 = inlined_call_operand.vmem [shape: f32[1,128], index: 1, kind: input, shape index: {}]   ;;  %s1143_s2 = inlined_call_operand.vmem [shape: f32[128,128], index: 2, kind: input, shape index: {}]   ;;  %s1144_s3 = inlined_call_operand.vmem [shape: f32[1,128], index: 3, kind: input, shape index: {}]   ;;  %s1145_s4 = inlined_call_operand.vmem [shape: f32[256,128], index: 4, kind: input, shape index: {}]   ;;  %s1146_s5 = inlined_call_operand.vmem [shape: f32[256,128], index: 5, kind: output, shape index: {}]  }
   0x1 LB: > { %s642_s19 = sadd.s32 4294967295, %s886_s18   ;;  %p646_p0 = scmp.ge.s32.totalorder %s886_s18, 1  ;;  %s886_s18 = sphi %s918_s18, %s15_s18  }
   0x2   : > { %p188_p1 = scmp.lt.s32.totalorder %s886_s18, 3 }
   0x4   : > { %p189_p2 = pnand %p646_p0, %p188_p1 }
   0x5   : > { %v402_v0 = vld [vmem:[%s1143_s2] sm:$0xff] (!%p189_p2)  ;;  %v403_v1 = vld [vmem:[%s1143_s2 + $0x8] sm:$0xff] (!%p189_p2)  ;;  %v404_v2 = vld [vmem:[%s1143_s2 + $0x10] sm:$0xff] (!%p189_p2)  ;;  %s647_s26 = sshll.u32 (!%p189_p2), %s642_s19, 4 }
   0x6   : > { %192 = sbr.rel (%p189_p2) target bundleno = 293 (0x125), region = 40  ;;  %v760_v3 = vpack.c.bf16 (!%p189_p2), %v403_v1, %v402_v0  ;;  %v405_v4 = vld [vmem:[%s1143_s2 + $0x18] sm:$0xff] (!%p189_p2)  ;;  %p217_p3 = scmp.lt.s32.totalorder (!%p189_p2), %s647_s26, 31  ;;  %v406_v6 = vld [vmem:[%s1143_s2 + $0x20] sm:$0xff] (!%p189_p2)  ;;  %v407_v7 = vld [vmem:[%s1143_s2 + $0x28] sm:$0xff] (!%p189_p2) }
   0x7   : > { %v764_v5 = vpack.c.bf16 (!%p189_p2), %v405_v4, %v404_v2  ;;  %v408_v8 = vld [vmem:[%s1143_s2 + $0x30] sm:$0xff] (!%p189_p2)  ;;  %v409_v9 = vld [vmem:[%s1143_s2 + $0x38] sm:$0xff] (!%p189_p2)  ;;  %v410_v10 = vld [vmem:[%s1143_s2 + $0x40] sm:$0xff] (!%p189_p2)  ;;  %v768_v12 = vpack.c.bf16 (!%p189_p2), %v407_v7, %v406_v6 }
   0x8   : > { %761 = vmatprep.subr.bf16.mxu0 (!%p189_p2), %v760_v3  ;;  %792 = vmatprep.subr.bf16.mxu1 (!%p189_p2), %v760_v3  ;;  %v411_v11 = vld [vmem:[%s1143_s2 + $0x48] sm:$0xff] (!%p189_p2)  ;;  %v962_v13 = vld [vmem:[%s1141_s0] ss:$0 sm:$0xff] (!%p189_p2)  ;;  %v772_v15 = vpack.c.bf16 (!%p189_p2), %v409_v9, %v408_v8  ;;  %v412_v31 = vld [vmem:[%s1143_s2 + $0x50] sm:$0xff] (!%p189_p2) }
   0x9   : > { %763 = vmatpush3.bf16.msra.mxu0 (!%p189_p2), %v760_v3  ;;  %800 = vmatpush3.bf16.msra.mxu1 (!%p189_p2), %v760_v3  ;;  %v974_v14 = vld [vmem:[%s1142_s1] ss:$0 sm:$0xff] (!%p189_p2)  ;;  %v976_v16 = vpack.c.bf16 (!%p189_p2), %v411_v11, %v410_v10  ;;  %v413_v32 = vld [vmem:[%s1143_s2 + $0x58] sm:$0xff] (!%p189_p2)  ;;  %v415_v3 = vld [vmem:[%s1143_s2 + $0x68] sm:$0xff] (!%p189_p2) }
   0xa   : > { %765 = vmatprep.subr.bf16.mxu0 (!%p189_p2), %v764_v5  ;;  %793 = vmatprep.subr.bf16.mxu1 (!%p189_p2), %v764_v5  ;;  %v780_v49 = vpack.c.bf16 (!%p189_p2), %v413_v32, %v412_v31  ;;  %v414_v2 = vld [vmem:[%s1143_s2 + $0x60] sm:$0xff] (!%p189_p2)  ;;  %v416_v10 = vld [vmem:[%s1143_s2 + $0x70] sm:$0xff] (!%p189_p2)  ;;  %v417_v11 = vld [vmem:[%s1143_s2 + $0x78] sm:$0xff] (!%p189_p2) }
   0xb   : > { %v784_v8 = vpack.c.bf16 (!%p189_p2), %v415_v3, %v414_v2 }
   0xd   : > { %s1148_s26 = smov (!%p217_p3, %s647_s26), 31  ;;  %767 = vmatpush3.bf16.msra.mxu0 %v764_v5  ;;  %801 = vmatpush3.bf16.msra.mxu1 %v764_v5 }
   0xe   : > { %s648_s16 = sshll.u32 %s1148_s26, 3  ;;  %769 = vmatprep.subr.bf16.mxu0 %v768_v12  ;;  %794 = vmatprep.subr.bf16.mxu1 %v768_v12 }
   0xf   : > { %s969_s22 = scalar_lea.vmem %s1145_s4, %s648_s16  ;;  %s1120_s19 = scalar_lea.vmem %s1146_s5, %s648_s16 }
  0x10   : > { %v228_v17 = vld [vmem:[%s969_s22] sm:$0xff]  ;;  %v229_v19 = vld [vmem:[%s969_s22 + $0x8] sm:$0xff]  ;;  %v230_v24 = vld [vmem:[%s969_s22 + $0x10] sm:$0xff] }
  0x11   : > { %v236_v18 = vld [vmem:[%s969_s22 + $0x40] sm:$0xff]  ;;  %v251_v20 = vmul.f32 %v962_v13, %v228_v17  ;;  %v252_v22 = vmul.f32 %v962_v13, %v229_v19  ;;  %v237_v23 = vld [vmem:[%s969_s22 + $0x48] sm:$0xff]  ;;  %v238_v25 = vld [vmem:[%s969_s22 + $0x50] sm:$0xff]  ;;  %v253_v27 = vmul.f32 %v962_v13, %v230_v24  ;;  %771 = vmatpush3.bf16.msra.mxu0 %v768_v12  ;;  %802 = vmatpush3.bf16.msra.mxu1 %v768_v12 }
  0x12   : > { %v259_v21 = vmul.f32 %v962_v13, %v236_v18  ;;  %v260_v26 = vmul.f32 %v962_v13, %v237_v23  ;;  %v261_v28 = vmul.f32 %v962_v13, %v238_v25  ;;  %v231_v29 = vld [vmem:[%s969_s22 + $0x18] sm:$0xff]  ;;  %v232_v37 = vld [vmem:[%s969_s22 + $0x20] sm:$0xff]  ;;  %v233_v43 = vld [vmem:[%s969_s22 + $0x28] sm:$0xff]  ;;  %773 = vmatprep.subr.bf16.mxu0 %v772_v15  ;;  %795 = vmatprep.subr.bf16.mxu1 %v772_v15 }
  0x13   : > { %v239_v30 = vld [vmem:[%s969_s22 + $0x58] sm:$0xff]  ;;  %v999_v33 = vadd.f32 %v974_v14, %v251_v20  ;;  %v1005_v35 = vadd.f32 %v974_v14, %v252_v22  ;;  %v254_v36 = vmul.f32 %v962_v13, %v231_v29  ;;  %v1013_v39 = vadd.f32 %v974_v14, %v253_v27  ;;  %v240_v42 = vld [vmem:[%s969_s22 + $0x60] sm:$0xff]  ;;  %v241_v44 = vld [vmem:[%s969_s22 + $0x68] sm:$0xff] }
  0x14   : > { %v1002_v34 = vadd.f32 %v974_v14, %v259_v21  ;;  %v1010_v38 = vadd.f32 %v974_v14, %v260_v26  ;;  %v1016_v40 = vadd.f32 %v974_v14, %v261_v28  ;;  %v262_v41 = vmul.f32 %v962_v13, %v239_v30  ;;  %v234_v53 = vld [vmem:[%s969_s22 + $0x30] sm:$0xff]  ;;  %v235_v22 = vld [vmem:[%s969_s22 + $0x38] sm:$0xff] }
  0x15   : > { %v653_v45 = vmul.f32 -1.442695, %v999_v33  ;;  %v654_v47 = vmul.f32 -1.442695, %v1005_v35  ;;  %v1026_v48 = vadd.f32 %v974_v14, %v254_v36  ;;  %v655_v51 = vmul.f32 -1.442695, %v1013_v39  ;;  %775 = vmatpush3.bf16.msra.mxu0 %v772_v15  ;;  %803 = vmatpush3.bf16.msra.mxu1 %v772_v15 }
  0x16   : > { %v661_v46 = vmul.f32 -1.442695, %v1002_v34  ;;  %v662_v50 = vmul.f32 -1.442695, %v1010_v38  ;;  %v1031_v52 = vadd.f32 %v974_v14, %v262_v41  ;;  %v663_v54 = vmul.f32 -1.442695, %v1016_v40  ;;  %777 = vmatprep.subr.bf16.mxu0 %v976_v16  ;;  %796 = vmatprep.subr.bf16.mxu1 %v976_v16 }
  0x17   : > { %816 = vpow2.f32 %v653_v45  ;;  %v255_v55 = vmul.f32 %v962_v13, %v232_v37  ;;  %v263_v56 = vmul.f32 %v962_v13, %v240_v42  ;;  %v656_v57 = vmul.f32 -1.442695, %v1026_v48  ;;  %v242_v19 = vld [vmem:[%s969_s22 + $0x70] sm:$0xff]  ;;  %v243_v25 = vld [vmem:[%s969_s22 + $0x78] sm:$0xff] }
  0x18   : > { %818 = vpow2.f32 %v661_v46  ;;  %v256_v58 = vmul.f32 %v962_v13, %v233_v43  ;;  %v264_v59 = vmul.f32 %v962_v13, %v241_v44  ;;  %v257_v62 = vmul.f32 %v962_v13, %v234_v53 }
  0x19   : > { %820 = vpow2.f32 %v654_v47  ;;  %v1041_v60 = vadd.f32 %v974_v14, %v255_v55  ;;  %v1044_v61 = vadd.f32 %v974_v14, %v263_v56  ;;  %v664_v63 = vmul.f32 -1.442695, %v1031_v52  ;;  %779 = vmatpush3.bf16.msra.mxu0 %v976_v16  ;;  %804 = vmatpush3.bf16.msra.mxu1 %v976_v16 }
  0x1a   : > { %822 = vpow2.f32 %v662_v50  ;;  %v1051_v0 = vadd.f32 %v974_v14, %v256_v58  ;;  %v1054_v1 = vadd.f32 %v974_v14, %v264_v59  ;;  %v1064_v5 = vadd.f32 %v974_v14, %v257_v62  ;;  %781 = vmatprep.subr.bf16.mxu0 %v780_v49  ;;  %797 = vmatprep.subr.bf16.mxu1 %v780_v49 }
  0x1b   : > { %824 = vpow2.f32 %v655_v51  ;;  %v657_v4 = vmul.f32 -1.442695, %v1041_v60  ;;  %v665_v6 = vmul.f32 -1.442695, %v1044_v61  ;;  %v788_v17 = vpack.c.bf16 %v417_v11, %v416_v10 }
  0x1c   : > { %826 = vpow2.f32 %v663_v54  ;;  %v658_v7 = vmul.f32 -1.442695, %v1051_v0  ;;  %v666_v9 = vmul.f32 -1.442695, %v1054_v1  ;;  %v659_v12 = vmul.f32 -1.442695, %v1064_v5 }
  0x1d   : > { %828 = vpow2.f32 %v656_v57  ;;  %783 = vmatpush3.bf16.msra.mxu0 %v780_v49  ;;  %805 = vmatpush3.bf16.msra.mxu1 %v780_v49  ;;  %v265_v28 = vmul.f32 %v962_v13, %v242_v19  ;;  %v258_v31 = vmul.f32 %v962_v13, %v235_v22  ;;  %v266_v37 = vmul.f32 %v962_v13, %v243_v25 }
  0x1e   : > { %830 = vpow2.f32 %v664_v63  ;;  %785 = vmatprep.subr.bf16.mxu0 %v784_v8  ;;  %798 = vmatprep.subr.bf16.mxu1 %v784_v8 }
  0x1f   : > { %832 = vpow2.f32 %v657_v4  ;;  %v1085_v45 = vadd.f32 %v974_v14, %v265_v28  ;;  %v1088_v49 = vadd.f32 %v974_v14, %v258_v31  ;;  %v1091_v51 = vadd.f32 %v974_v14, %v266_v37  ;;  %v669_v28 = vld [vmem:[%s1144_s3] ss:$0 sm:$0xff] }
  0x20   : > { %834 = vpow2.f32 %v665_v6 }
  0x21   : > { %v817_v15 = vpop.eup %816  ;;  %836 = vpow2.f32 %v658_v7  ;;  %787 = vmatpush3.bf16.msra.mxu0 %v784_v8  ;;  %806 = vmatpush3.bf16.msra.mxu1 %v784_v8  ;;  %v667_v57 = vmul.f32 -1.442695, %v1085_v45  ;;  %v660_v62 = vmul.f32 -1.442695, %v1088_v49  ;;  %v668_v14 = vmul.f32 -1.442695, %v1091_v51 }
  0x22   : > { %v819_v16 = vpop.eup %818  ;;  %v338_v18 = vadd.f32 1.0, %v817_v15  ;;  %838 = vpow2.f32 %v666_v9  ;;  %789 = vmatprep.subr.bf16.mxu0 %v788_v17  ;;  %799 = vmatprep.subr.bf16.mxu1 %v788_v17 }
  0x23   : > { %v821_v20 = vpop.eup %820  ;;  %v346_v21 = vadd.f32 1.0, %v819_v16  ;;  %840 = vpow2.f32 %v659_v12 }
  0x24   : > { %v823_v23 = vpop.eup %822  ;;  %842 = vrcp.f32 %v338_v18  ;;  %v339_v24 = vadd.f32 1.0, %v821_v20 }
  0x25   : > { %v825_v26 = vpop.eup %824  ;;  %844 = vrcp.f32 %v346_v21  ;;  %v347_v27 = vadd.f32 1.0, %v823_v23  ;;  %791 = vmatpush3.bf16.msra.mxu0 %v788_v17  ;;  %807 = vmatpush3.bf16.msra.mxu1 %v788_v17 }
  0x26   : > { %v827_v29 = vpop.eup %826  ;;  %846 = vrcp.f32 %v339_v24  ;;  %v340_v30 = vadd.f32 1.0, %v825_v26 }
  0x27   : > { %v829_v32 = vpop.eup %828  ;;  %848 = vrcp.f32 %v347_v27  ;;  %v348_v36 = vadd.f32 1.0, %v827_v29 }
  0x28   : > { %v831_v41 = vpop.eup %830  ;;  %850 = vrcp.f32 %v340_v30  ;;  %v341_v42 = vadd.f32 1.0, %v829_v32 }
  0x29   : > { %v833_v43 = vpop.eup %832  ;;  %852 = vrcp.f32 %v348_v36  ;;  %v349_v44 = vadd.f32 1.0, %v831_v41 }
  0x2a   : > { %v835_v46 = vpop.eup %834  ;;  %854 = vrcp.f32 %v341_v42  ;;  %v342_v47 = vadd.f32 1.0, %v833_v43 }
  0x2b   : > { %v837_v50 = vpop.eup %836  ;;  %856 = vrcp.f32 %v349_v44  ;;  %v350_v13 = vadd.f32 1.0, %v835_v46 }
  0x2c   : > { %v839_v53 = vpop.eup %838  ;;  %858 = vrcp.f32 %v342_v47  ;;  %v343_v54 = vadd.f32 1.0, %v837_v50 }
  0x2d   : > { %v841_v55 = vpop.eup %840  ;;  %860 = vrcp.f32 %v350_v13  ;;  %v351_v56 = vadd.f32 1.0, %v839_v53 }
  0x2e   : > { %v843_v58 = vpop.eup %842  ;;  %862 = vrcp.f32 %v343_v54  ;;  %v344_v59 = vadd.f32 1.0, %v841_v55 }
  0x2f   : > { %v845_v63 = vpop.eup %844  ;;  %v386_v2 = vmul.f32 %v843_v58, %v999_v33  ;;  %864 = vrcp.f32 %v351_v56 }
  0x30   : > { %v847_v3 = vpop.eup %846  ;;  %v394_v4 = vmul.f32 %v845_v63, %v1002_v34  ;;  %866 = vrcp.f32 %v344_v59 }
  0x31   : > { %v849_v6 = vpop.eup %848  ;;  %736 = vmatprep.mubr.f32.mxu0 %v386_v2  ;;  %v387_v7 = vmul.f32 %v847_v3, %v1005_v35  ;;  %868 = vpow2.f32 %v667_v57 }
  0x32   : > { %v851_v8 = vpop.eup %850  ;;  %748 = vmatprep.mubr.f32.mxu1 %v394_v4  ;;  %v395_v9 = vmul.f32 %v849_v6, %v1010_v38  ;;  %870 = vpow2.f32 %v660_v62 }
  0x33   : > { %v853_v10 = vpop.eup %852  ;;  %737 = vmatmul.mubr.f32.vlgmr.msra.gmra.mrb[0].mxu0 %v387_v7  ;;  %v388_v33 = vmul.f32 %v851_v8, %v1013_v39  ;;  %872 = vpow2.f32 %v668_v14 }
  0x34   : > { %v855_v11 = vpop.eup %854  ;;  %749 = vmatmul.mubr.f32.vlgmr.msra.gmra.mrb[0].mxu1 %v395_v9  ;;  %v396_v34 = vmul.f32 %v853_v10, %v1016_v40 }
  0x35   : > { %v857_v12 = vpop.eup %856  ;;  %739 = vmatprep.mubr.f32.mxu0 %v388_v33  ;;  %v389_v15 = vmul.f32 %v855_v11, %v1026_v48 }
  0x36   : > { %v859_v35 = vpop.eup %858  ;;  %751 = vmatprep.mubr.f32.mxu1 %v396_v34  ;;  %v397_v16 = vmul.f32 %v857_v12, %v1031_v52 }
  0x37   : > { %v861_v17 = vpop.eup %860  ;;  %740 = vmatmul.mubr.f32.gmra.mrb[2].mxu0 %v389_v15  ;;  %v390_v38 = vmul.f32 %v859_v35, %v1041_v60 }
  0x38   : > { %v863_v18 = vpop.eup %862  ;;  %752 = vmatmul.mubr.f32.gmra.mrb[2].mxu1 %v397_v16  ;;  %v398_v39 = vmul.f32 %v861_v17, %v1044_v61 }
  0x39   : > { %v865_v19 = vpop.eup %864  ;;  %742 = vmatprep.mubr.f32.mxu0 %v390_v38  ;;  %v391_v40 = vmul.f32 %v863_v18, %v1051_v0 }
  0x3a   : > { %v867_v20 = vpop.eup %866  ;;  %754 = vmatprep.mubr.f32.mxu1 %v398_v39  ;;  %v399_v48 = vmul.f32 %v865_v19, %v1054_v1 }
  0x3b   : > { %v869_v21 = vpop.eup %868  ;;  %743 = vmatmul.mubr.f32.gmra.mrb[4].mxu0 %v391_v40  ;;  %v392_v52 = vmul.f32 %v867_v20, %v1064_v5 }
  0x3c   : > { %v871_v22 = vpop.eup %870  ;;  %755 = vmatmul.mubr.f32.gmra.mrb[4].mxu1 %v399_v48  ;;  %v352_v23 = vadd.f32 1.0, %v869_v21 }
  0x3d   : > { %v873_v60 = vpop.eup %872  ;;  %745 = vmatprep.mubr.f32.mxu0 %v392_v52  ;;  %v345_v24 = vadd.f32 1.0, %v871_v22 }
  0x3e   : > { %874 = vrcp.f32 %v352_v23  ;;  %v353_v61 = vadd.f32 1.0, %v873_v60 }
  0x3f   : > { %876 = vrcp.f32 %v345_v24 }
  0x40   : > { %878 = vrcp.f32 %v353_v61 }
  0x48   : > { %v875_v0 = vpop.eup %874 }
  0x49   : > { %v877_v25 = vpop.eup %876  ;;  %v400_v26 = vmul.f32 %v875_v0, %v1085_v45 }
  0x4a   : > { %v879_v1 = vpop.eup %878  ;;  %v393_v27 = vmul.f32 %v877_v25, %v1088_v49 }
  0x4b   : > { %757 = vmatprep.mubr.f32.mxu1 %v400_v26  ;;  %v401_v5 = vmul.f32 %v879_v1, %v1091_v51 }
  0x4c   : > { %746 = vmatmul.mubr.f32.gmra.mrb[6].mxu0 %v393_v27 }
  0x4d   : > { %758 = vmatmul.mubr.f32.gmra.mrb[6].mxu1 %v401_v5 }
 0x106   : > { %v738_v29 = vpop.f32.mrb[0].mxu0 }
 0x107   : > { %v497_v30 = vadd.f32 %v738_v29, %v669_v28  ;;  %v750_v31 = vpop.f32.mrb[0].mxu1  ;;  %v491_v32 = vpop.f32.mrb[1].mxu0 }
 0x108   : > { %v537_v36 = vadd.f32 %v750_v31, %v669_v28  ;;  %v492_v37 = vadd.f32 %v669_v28, %v491_v32  ;;  %v531_v41 = vpop.f32.mrb[1].mxu1 }
 0x109   : > { %571 = vst [vmem:[%s1120_s19 + $0x8] sm:$0xff] %v497_v30  ;;  %v532_v42 = vadd.f32 %v669_v28, %v531_v41 }
 0x10a   : > { %579 = vst [vmem:[%s1120_s19 + $0x48] sm:$0xff] %v537_v36  ;;  %570 = vst [vmem:[%s1120_s19] sm:$0xff] %v492_v37  ;;  %v741_v43 = vpop.f32.mrb[2].mxu0 }
 0x10b   : > { %578 = vst [vmem:[%s1120_s19 + $0x40] sm:$0xff] %v532_v42  ;;  %v507_v44 = vadd.f32 %v741_v43, %v669_v28  ;;  %v753_v45 = vpop.f32.mrb[2].mxu1  ;;  %v501_v46 = vpop.f32.mrb[3].mxu0 }
 0x10c   : > { %v547_v47 = vadd.f32 %v753_v45, %v669_v28  ;;  %v502_v49 = vadd.f32 %v669_v28, %v501_v46  ;;  %v541_v50 = vpop.f32.mrb[3].mxu1 }
 0x10d   : > { %573 = vst [vmem:[%s1120_s19 + $0x18] sm:$0xff] %v507_v44  ;;  %v542_v13 = vadd.f32 %v669_v28, %v541_v50 }
 0x10e   : > { %581 = vst [vmem:[%s1120_s19 + $0x58] sm:$0xff] %v547_v47  ;;  %572 = vst [vmem:[%s1120_s19 + $0x10] sm:$0xff] %v502_v49  ;;  %v744_v51 = vpop.f32.mrb[4].mxu0 }
 0x10f   : > { %580 = vst [vmem:[%s1120_s19 + $0x50] sm:$0xff] %v542_v13  ;;  %v517_v53 = vadd.f32 %v744_v51, %v669_v28  ;;  %v756_v54 = vpop.f32.mrb[4].mxu1  ;;  %v511_v55 = vpop.f32.mrb[5].mxu0 }
 0x110   : > { %v557_v56 = vadd.f32 %v756_v54, %v669_v28  ;;  %v512_v57 = vadd.f32 %v669_v28, %v511_v55  ;;  %v551_v58 = vpop.f32.mrb[5].mxu1 }
 0x111   : > { %575 = vst [vmem:[%s1120_s19 + $0x28] sm:$0xff] %v517_v53  ;;  %v552_v59 = vadd.f32 %v669_v28, %v551_v58 }
 0x112   : > { %583 = vst [vmem:[%s1120_s19 + $0x68] sm:$0xff] %v557_v56  ;;  %574 = vst [vmem:[%s1120_s19 + $0x20] sm:$0xff] %v512_v57 }
 0x113   : > { %582 = vst [vmem:[%s1120_s19 + $0x60] sm:$0xff] %v552_v59 }
 0x11f   : > { %v747_v62 = vpop.f32.mrb[6].mxu0 }
 0x120   : > { %v527_v63 = vadd.f32 %v747_v62, %v669_v28  ;;  %v759_v2 = vpop.f32.mrb[6].mxu1  ;;  %v521_v14 = vpop.f32.mrb[7].mxu0 }
 0x121   : > { %v567_v3 = vadd.f32 %v759_v2, %v669_v28  ;;  %v522_v4 = vadd.f32 %v669_v28, %v521_v14  ;;  %v561_v6 = vpop.f32.mrb[7].mxu1 }
 0x122   : > { %577 = vst [vmem:[%s1120_s19 + $0x38] sm:$0xff] %v527_v63  ;;  %v562_v7 = vadd.f32 %v669_v28, %v561_v6 }
 0x123   : > { %585 = vst [vmem:[%s1120_s19 + $0x78] sm:$0xff] %v567_v3  ;;  %576 = vst [vmem:[%s1120_s19 + $0x30] sm:$0xff] %v522_v4 }
 0x124   : > { %584 = vst [vmem:[%s1120_s19 + $0x70] sm:$0xff] %v562_v7 }
 0x125 PF: > { %s15_s18 = sadd.s32 1, %s886_s18  }
 0x126   : > { %p12_p4 = scmp.ge.s32.totalorder %s15_s18, 4  }
 0x128   :  { %14 = sbr.rel (!%p12_p4) target bundleno = 1 (0x1), region = 70 }

</bundles_post_ra>
